<compile_context>
chip_gen: v7x
topology: tpu7x:2x2x1
jax: 0.10.0
libtpu: 0.0.40
codegen_flags: <defaults>
</compile_context>

<pallas_src>
import functools

import jax
import jax.numpy as jnp
from jax.experimental import pallas as pl
from jax.experimental.pallas import tpu as pltpu


# ------------------------------- helpers ----------------------------------- #

def _round_up(v, m):
    return ((v + m - 1) // m) * m


def _vmem_capacity_bytes():
    try:
        return int(pltpu.get_tpu_info().vmem_capacity_bytes)
    except Exception:
        return 64 << 20            # conservative default (v7x per-core physical)


def _pick_batch_tile(n, l_pad, max_lanes):
    """Sequences per grid step: the largest divisor of n whose lane width fits
    the budget, preferring >= 2 grid steps (feeds both v7x TensorCores).  Never
    falls back to the whole batch when it does not fit — returns 1 instead."""
    divs = [d for d in range(1, n + 1) if n % d == 0 and d * l_pad <= max_lanes]
    if not divs:
        return 1
    multi = [d for d in divs if n // d >= 2]
    return max(multi) if multi else max(divs)


def _const_spec(shape, single_buffer):
    """BlockSpec for a grid-invariant (weight/bias) input."""
    rank = len(shape)
    index_map = lambda n: (0,) * rank
    if single_buffer:
        # Constant index_map -> the second pipeline buffer is pure VMEM waste.
        return pl.BlockSpec(shape, index_map, pipeline_mode=pl.Buffered(1))
    return pl.BlockSpec(shape, index_map)


# ----------------------------- Pallas kernel ------------------------------- #

def _tcn_fused_kernel(*refs, has_down, dilations, K, L, L_pad):
    """Fused forward of all TemporalBlocks for one batch tile.

    refs layout:
      refs[0]    : x_ref,  (C_in_pad, nb*L_pad)  activation of the batch tile
      refs[1:-1] : per layer: w1 (K,Co,Ci), b1 (Co,1), w2 (K,Co,Co), b2 (Co,1)
                   [, wd (Co,Ci), bd (Co,1)]  (wd/bd only when C_in != C_out)
      refs[-1]   : o_ref,  (C_last_pad, nb*L_pad)
    """
    x_ref = refs[0]
    o_ref = refs[-1]
    params = refs[1:-1]

    width = x_ref.shape[-1]            # nb * L_pad, multiple of 128 (lane axis)

    # Position within each (padded) sequence; hoisted once (iota is not CSE'd).
    t = jax.lax.broadcasted_iota(jnp.int32, (1, width), 1) % L_pad

    # One edge mask per unique tap shift, shared across conv1/conv2 and layers.
    shifts = set()
    for dil in dilations:
        p = (K - 1) // 2 * dil
        for k in range(K):
            s = k * dil - p
            if s != 0:
                shifts.add(s)
    masks = {s: jnp.logical_and(t + s >= 0, t + s < L) for s in sorted(shifts)}

    def dilated_conv(h, w_ref, b_ref, dilation):
        # h: (C_pad, width).  "Same" dilated conv as K accumulated matmuls over
        # rolled + masked views (tap shift s = k*d - p).  No im2col slab is
        # materialized (no K-fold activation copy, no ragged concatenate).
        p = (K - 1) // 2 * dilation
        acc = None
        for k in range(K):                       # static, unrolled
            s = k * dilation - p
            if s == 0:
                v = h
            else:
                rolled = pltpu.roll(h, shift=(-s) % width, axis=1)
                v = jnp.where(masks[s], rolled, 0).astype(h.dtype)
            part = jnp.dot(w_ref[k], v, preferred_element_type=jnp.float32)
            acc = part if acc is None else acc + part
        return acc + b_ref[...]                  # bias added once, f32

    cur = x_ref[...]                             # compute-dtype activation
    idx = 0
    for li, dil in enumerate(dilations):
        w1 = params[idx]
        b1 = params[idx + 1]
        w2 = params[idx + 2]
        b2 = params[idx + 3]
        idx += 4

        # conv1 -> ReLU   (nn.Dropout is identity at inference -> not emitted)
        h = jnp.maximum(dilated_conv(cur, w1, b1, dil), 0.0).astype(cur.dtype)
        # conv2
        out = dilated_conv(h, w2, b2, dil)
        # residual: 1x1 conv only when channels change; identity is free.
        if has_down[li]:
            wd = params[idx]
            bd = params[idx + 1]
            idx += 2
            res = jnp.dot(wd[...], cur, preferred_element_type=jnp.float32) + bd[...]
        else:
            res = cur.astype(jnp.float32)        # rematerialized, no persistent f32 copy
        cur = jnp.maximum(out + res, 0.0).astype(x_ref.dtype)

    o_ref[...] = cur.astype(o_ref.dtype)


# -------------------------------- wrapper ----------------------------------- #

def tcn_forward(x, params, kernel_size, compute_dtype=jnp.float32):
    """x: (N, C_in, L) float32 -> (N, C_last, L) float32.

    params: list of (w1, b1, w2, b2, wd, bd) per TemporalBlock; wd/bd are None
    when n_inputs == n_outputs (identity residual).
    compute_dtype: jnp.float32 (exact) or jnp.bfloat16 (v6e/v7x MXU throughput;
    accumulation stays f32, tolerance must be loosened with depth).
    """
    assert kernel_size % 2 == 1, "kernel_size must be odd for length-preserving TCN"
    N, C_in, L = x.shape
    C_last = params[-1][0].shape[0]

    sub = 8 if compute_dtype == jnp.float32 else 16    # sublane granularity
    L_pad = _round_up(L, 128)                          # lane-dense (unmasked) stores
    C_in_pad = _round_up(C_in, sub)

    vmem_cap = _vmem_capacity_bytes()
    max_lanes = 8192 if vmem_cap >= (96 << 20) else 4096
    vmem_limit = min(vmem_cap * 3 // 4, 100 << 20)

    nb = _pick_batch_tile(N, L_pad, max_lanes)
    num_tiles = N // nb
    width = nb * L_pad                                 # multiple of 128 by construction

    # Fold batch into the lane axis: (N, C_in, L) -> (C_in_pad, N*L_pad), zero padded.
    # (If callers already hold a (C, N*L) layout, these transposes — an extra HBM
    #  pass — should be elided by keeping that layout across surrounding ops.)
    xp = jnp.pad(x, ((0, 0), (0, C_in_pad - C_in), (0, L_pad - L)))
    x2 = jnp.transpose(xp, (1, 0, 2)).reshape(C_in_pad, N * L_pad).astype(compute_dtype)

    # Pre-reshape / pad weights once: taps along the leading axis, channel dims
    # padded to sublane multiples so nothing inside the kernel is ragged.
    flat_params = []
    has_down, dilations = [], []
    c_prev_pad = C_in_pad
    for i, (w1, b1, w2, b2, wd, bd) in enumerate(params):
        dilations.append(2 ** i)
        c_out, c_in_i, _k = w1.shape
        c_out_pad = _round_up(c_out, sub)
        w1s = jnp.pad(jnp.transpose(w1, (2, 0, 1)),
                      ((0, 0), (0, c_out_pad - c_out), (0, c_prev_pad - c_in_i)))
        w2s = jnp.pad(jnp.transpose(w2, (2, 0, 1)),
                      ((0, 0), (0, c_out_pad - c_out), (0, c_out_pad - c_out)))
        layer = [w1s.astype(compute_dtype),
                 jnp.pad(b1, ((0, c_out_pad - c_out), (0, 0))).astype(jnp.float32),
                 w2s.astype(compute_dtype),
                 jnp.pad(b2, ((0, c_out_pad - c_out), (0, 0))).astype(jnp.float32)]
        if wd is None:
            has_down.append(False)
        else:
            has_down.append(True)
            layer += [
                jnp.pad(wd, ((0, c_out_pad - c_out),
                             (0, c_prev_pad - c_in_i))).astype(compute_dtype),
                jnp.pad(bd, ((0, c_out_pad - c_out), (0, 0))).astype(jnp.float32)]
        flat_params += layer
        c_prev_pad = c_out_pad
    C_last_pad = c_prev_pad

    kernel = functools.partial(
        _tcn_fused_kernel,
        has_down=tuple(has_down),
        dilations=tuple(dilations),
        K=kernel_size,
        L=L,
        L_pad=L_pad,
    )

    def _run(single_buffer_weights):
        in_specs = [pl.BlockSpec((C_in_pad, width), lambda n: (0, n))]
        in_specs += [_const_spec(a.shape, single_buffer_weights) for a in flat_params]
        return pl.pallas_call(
            kernel,
            out_shape=jax.ShapeDtypeStruct((C_last_pad, N * L_pad), jnp.float32),
            grid_spec=pltpu.PrefetchScalarGridSpec(
                num_scalar_prefetch=0,
                grid=(num_tiles,),
                in_specs=in_specs,
                out_specs=pl.BlockSpec((C_last_pad, width), lambda n: (0, n)),
            ),
            compiler_params=pltpu.CompilerParams(
                dimension_semantics=("parallel",),
                vmem_limit_bytes=vmem_limit,
            ),
        )(x2, *flat_params)

    try:
        out2 = _run(True)          # single-buffered grid-invariant weights
    except Exception:
        out2 = _run(False)         # fallback: default double-buffering

    out = out2.reshape(C_last_pad, N, L_pad).transpose(1, 0, 2)
    return out[:, :C_last, :L]


# ------------------------- parameter construction --------------------------- #

def init_tcn_params(key, num_inputs, num_channels, kernel_size):
    """Deterministic synthetic init mirroring TemporalBlock.init_weights
    (conv weights ~ N(0, 0.01)); biases also drawn deterministically.
    downsample (wd, bd) is None when in_c == out_c, matching PyTorch."""
    params = []
    for i, out_c in enumerate(num_channels):
        in_c = num_inputs if i == 0 else num_channels[i - 1]
        key, k1, k2, k3, k4, k5, k6 = jax.random.split(key, 7)
        w1 = 0.01 * jax.random.normal(k1, (out_c, in_c, kernel_size), jnp.float32)
        b1 = 0.01 * jax.random.normal(k2, (out_c, 1), jnp.float32)
        w2 = 0.01 * jax.random.normal(k3, (out_c, out_c, kernel_size), jnp.float32)
        b2 = 0.01 * jax.random.normal(k4, (out_c, 1), jnp.float32)
        if in_c != out_c:
            wd = 0.01 * jax.random.normal(k5, (out_c, in_c), jnp.float32)
            bd = 0.01 * jax.random.normal(k6, (out_c, 1), jnp.float32)
        else:
            wd, bd = None, None        # residual is exact identity
        params.append((w1, b1, w2, b2, wd, bd))
    return params


# ------------------------------ pure-JAX ref --------------------------------- #

def _conv1d_ref(x, w, b, dilation, padding):
    y = jax.lax.conv_general_dilated(
        x, w, window_strides=(1,), padding=[(padding, padding)],
        rhs_dilation=(dilation,), dimension_numbers=('NCH', 'OIH', 'NCH'))
    return y + b[None]


def _tcn_ref(x, params, kernel_size):
    for i, (w1, b1, w2, b2, wd, bd) in enumerate(params):
        dilation = 2 ** i
        padding = (kernel_size - 1) // 2 * dilation
        h = jnp.maximum(_conv1d_ref(x, w1, b1, dilation, padding), 0.0)
        out = _conv1d_ref(h, w2, b2, dilation, padding)
        res = x if wd is None else _conv1d_ref(x, wd[:, :, None], bd, 1, 0)
        x = jnp.maximum(out + res, 0.0)
    return x


# ---------------------------------- main ------------------------------------- #

if __name__ == "__main__":
    N, C_IN, L = 2, 4, 16
    NUM_CHANNELS = [8, 8, 6]       # three TemporalBlocks (dilations 1, 2, 4);
                                   # the middle one exercises the identity residual
    KERNEL_SIZE = 3                # odd -> length-preserving, as the module requires

    key = jax.random.PRNGKey(0)
    kx, kp = jax.random.split(key)
    x = jax.random.normal(kx, (N, C_IN, L), jnp.float32)
    params = init_tcn_params(kp, C_IN, NUM_CHANNELS, KERNEL_SIZE)

    y = tcn_forward(x, params, KERNEL_SIZE)          # f32 path (exact)
    y = jax.block_until_ready(y)

    y_ref = _tcn_ref(x, params, KERNEL_SIZE)
    assert y.shape == (N, NUM_CHANNELS[-1], L), y.shape
    assert jnp.allclose(y, y_ref, rtol=1e-5, atol=1e-5), \
        float(jnp.max(jnp.abs(y - y_ref)))

    print("KERNEL_OK")
</pallas_src>

<mosaic_0001>
module attributes {stable_mosaic.version = 11 : i64} {
  func.func @_tcn_fused_kernel(%arg0: i32, %arg1: memref<8x128xf32, #tpu.memory_space<vmem>>, %arg2: memref<3x8x8xf32, #tpu.memory_space<vmem>>, %arg3: memref<8x1xf32, #tpu.memory_space<vmem>>, %arg4: memref<3x8x8xf32, #tpu.memory_space<vmem>>, %arg5: memref<8x1xf32, #tpu.memory_space<vmem>>, %arg6: memref<8x8xf32, #tpu.memory_space<vmem>>, %arg7: memref<8x1xf32, #tpu.memory_space<vmem>>, %arg8: memref<3x8x8xf32, #tpu.memory_space<vmem>>, %arg9: memref<8x1xf32, #tpu.memory_space<vmem>>, %arg10: memref<3x8x8xf32, #tpu.memory_space<vmem>>, %arg11: memref<8x1xf32, #tpu.memory_space<vmem>>, %arg12: memref<3x8x8xf32, #tpu.memory_space<vmem>>, %arg13: memref<8x1xf32, #tpu.memory_space<vmem>>, %arg14: memref<3x8x8xf32, #tpu.memory_space<vmem>>, %arg15: memref<8x1xf32, #tpu.memory_space<vmem>>, %arg16: memref<8x8xf32, #tpu.memory_space<vmem>>, %arg17: memref<8x1xf32, #tpu.memory_space<vmem>>, %arg18: memref<8x128xf32, #tpu.memory_space<vmem>>) attributes {dimension_semantics = [#tpu.dimension_semantics<parallel>], iteration_bounds = array<i64: 2>, scalar_prefetch = 0 : i64, scratch_operands = 0 : i64, tpu.core_type = #tpu.core_type<tc>, window_params = [{transform_indices = @transform_0, window_bounds = array<i64: 8, 128>}, {pipeline_mode = #tpu.pipeline_mode<synchronous>, transform_indices = @transform_1, window_bounds = array<i64: 3, 8, 8>}, {pipeline_mode = #tpu.pipeline_mode<synchronous>, transform_indices = @transform_2, window_bounds = array<i64: 8, 1>}, {pipeline_mode = #tpu.pipeline_mode<synchronous>, transform_indices = @transform_3, window_bounds = array<i64: 3, 8, 8>}, {pipeline_mode = #tpu.pipeline_mode<synchronous>, transform_indices = @transform_4, window_bounds = array<i64: 8, 1>}, {pipeline_mode = #tpu.pipeline_mode<synchronous>, transform_indices = @transform_5, window_bounds = array<i64: 8, 8>}, {pipeline_mode = #tpu.pipeline_mode<synchronous>, transform_indices = @transform_6, window_bounds = array<i64: 8, 1>}, {pipeline_mode = #tpu.pipeline_mode<synchronous>, transform_indices = @transform_7, window_bounds = array<i64: 3, 8, 8>}, {pipeline_mode = #tpu.pipeline_mode<synchronous>, transform_indices = @transform_8, window_bounds = array<i64: 8, 1>}, {pipeline_mode = #tpu.pipeline_mode<synchronous>, transform_indices = @transform_9, window_bounds = array<i64: 3, 8, 8>}, {pipeline_mode = #tpu.pipeline_mode<synchronous>, transform_indices = @transform_10, window_bounds = array<i64: 8, 1>}, {pipeline_mode = #tpu.pipeline_mode<synchronous>, transform_indices = @transform_11, window_bounds = array<i64: 3, 8, 8>}, {pipeline_mode = #tpu.pipeline_mode<synchronous>, transform_indices = @transform_12, window_bounds = array<i64: 8, 1>}, {pipeline_mode = #tpu.pipeline_mode<synchronous>, transform_indices = @transform_13, window_bounds = array<i64: 3, 8, 8>}, {pipeline_mode = #tpu.pipeline_mode<synchronous>, transform_indices = @transform_14, window_bounds = array<i64: 8, 1>}, {pipeline_mode = #tpu.pipeline_mode<synchronous>, transform_indices = @transform_15, window_bounds = array<i64: 8, 8>}, {pipeline_mode = #tpu.pipeline_mode<synchronous>, transform_indices = @transform_16, window_bounds = array<i64: 8, 1>}, {transform_indices = @transform_17, window_bounds = array<i64: 8, 128>}]} {
    %0 = tpu.iota {dimensions = array<i32: 1>} : vector<1x128xi32>
    %c128_i32 = arith.constant 128 : i32
    %c0_i32 = arith.constant 0 : i32
    %1 = arith.cmpi eq, %c128_i32, %c0_i32 : i32
    %c1_i32 = arith.constant 1 : i32
    %2 = arith.select %1, %c1_i32, %c128_i32 : i32
    %3 = vector.broadcast %2 : i32 to vector<1x128xi32>
    %4 = arith.remsi %0, %3 : vector<1x128xi32>
    %c0_i32_0 = arith.constant 0 : i32
    %5 = vector.broadcast %c0_i32_0 : i32 to vector<1x128xi32>
    %6 = arith.cmpi ne, %4, %5 : vector<1x128xi32>
    %c0_i32_1 = arith.constant 0 : i32
    %7 = vector.broadcast %c0_i32_1 : i32 to vector<1x128xi32>
    %8 = arith.cmpi slt, %4, %7 : vector<1x128xi32>
    %c0_i32_2 = arith.constant 0 : i32
    %9 = arith.cmpi slt, %2, %c0_i32_2 : i32
    %10 = vector.broadcast %9 : i1 to vector<1x128xi1>
    %11 = vector.broadcast %10 : vector<1x128xi1> to vector<1x128xi1>
    %12 = arith.xori %8, %11 : vector<1x128xi1>
    %13 = arith.andi %12, %6 : vector<1x128xi1>
    %14 = vector.broadcast %2 : i32 to vector<1x128xi32>
    %15 = arith.addi %4, %14 : vector<1x128xi32>
    %16 = arith.select %13, %15, %4 : vector<1x128xi1>, vector<1x128xi32>
    %c-4_i32 = arith.constant -4 : i32
    %17 = vector.broadcast %c-4_i32 : i32 to vector<1x128xi32>
    %18 = arith.addi %16, %17 : vector<1x128xi32>
    %c0_i32_3 = arith.constant 0 : i32
    %19 = vector.broadcast %c0_i32_3 : i32 to vector<1x128xi32>
    %20 = arith.cmpi sge, %18, %19 : vector<1x128xi32>
    %c-4_i32_4 = arith.constant -4 : i32
    %21 = vector.broadcast %c-4_i32_4 : i32 to vector<1x128xi32>
    %22 = arith.addi %16, %21 : vector<1x128xi32>
    %c16_i32 = arith.constant 16 : i32
    %23 = vector.broadcast %c16_i32 : i32 to vector<1x128xi32>
    %24 = arith.cmpi slt, %22, %23 : vector<1x128xi32>
    %25 = arith.andi %20, %24 : vector<1x128xi1>
    %c-2_i32 = arith.constant -2 : i32
    %26 = vector.broadcast %c-2_i32 : i32 to vector<1x128xi32>
    %27 = arith.addi %16, %26 : vector<1x128xi32>
    %c0_i32_5 = arith.constant 0 : i32
    %28 = vector.broadcast %c0_i32_5 : i32 to vector<1x128xi32>
    %29 = arith.cmpi sge, %27, %28 : vector<1x128xi32>
    %c-2_i32_6 = arith.constant -2 : i32
    %30 = vector.broadcast %c-2_i32_6 : i32 to vector<1x128xi32>
    %31 = arith.addi %16, %30 : vector<1x128xi32>
    %c16_i32_7 = arith.constant 16 : i32
    %32 = vector.broadcast %c16_i32_7 : i32 to vector<1x128xi32>
    %33 = arith.cmpi slt, %31, %32 : vector<1x128xi32>
    %34 = arith.andi %29, %33 : vector<1x128xi1>
    %c-1_i32 = arith.constant -1 : i32
    %35 = vector.broadcast %c-1_i32 : i32 to vector<1x128xi32>
    %36 = arith.addi %16, %35 : vector<1x128xi32>
    %c0_i32_8 = arith.constant 0 : i32
    %37 = vector.broadcast %c0_i32_8 : i32 to vector<1x128xi32>
    %38 = arith.cmpi sge, %36, %37 : vector<1x128xi32>
    %c-1_i32_9 = arith.constant -1 : i32
    %39 = vector.broadcast %c-1_i32_9 : i32 to vector<1x128xi32>
    %40 = arith.addi %16, %39 : vector<1x128xi32>
    %c16_i32_10 = arith.constant 16 : i32
    %41 = vector.broadcast %c16_i32_10 : i32 to vector<1x128xi32>
    %42 = arith.cmpi slt, %40, %41 : vector<1x128xi32>
    %43 = arith.andi %38, %42 : vector<1x128xi1>
    %c1_i32_11 = arith.constant 1 : i32
    %44 = vector.broadcast %c1_i32_11 : i32 to vector<1x128xi32>
    %45 = arith.addi %16, %44 : vector<1x128xi32>
    %c0_i32_12 = arith.constant 0 : i32
    %46 = vector.broadcast %c0_i32_12 : i32 to vector<1x128xi32>
    %47 = arith.cmpi sge, %45, %46 : vector<1x128xi32>
    %c1_i32_13 = arith.constant 1 : i32
    %48 = vector.broadcast %c1_i32_13 : i32 to vector<1x128xi32>
    %49 = arith.addi %16, %48 : vector<1x128xi32>
    %c16_i32_14 = arith.constant 16 : i32
    %50 = vector.broadcast %c16_i32_14 : i32 to vector<1x128xi32>
    %51 = arith.cmpi slt, %49, %50 : vector<1x128xi32>
    %52 = arith.andi %47, %51 : vector<1x128xi1>
    %c2_i32 = arith.constant 2 : i32
    %53 = vector.broadcast %c2_i32 : i32 to vector<1x128xi32>
    %54 = arith.addi %16, %53 : vector<1x128xi32>
    %c0_i32_15 = arith.constant 0 : i32
    %55 = vector.broadcast %c0_i32_15 : i32 to vector<1x128xi32>
    %56 = arith.cmpi sge, %54, %55 : vector<1x128xi32>
    %c2_i32_16 = arith.constant 2 : i32
    %57 = vector.broadcast %c2_i32_16 : i32 to vector<1x128xi32>
    %58 = arith.addi %16, %57 : vector<1x128xi32>
    %c16_i32_17 = arith.constant 16 : i32
    %59 = vector.broadcast %c16_i32_17 : i32 to vector<1x128xi32>
    %60 = arith.cmpi slt, %58, %59 : vector<1x128xi32>
    %61 = arith.andi %56, %60 : vector<1x128xi1>
    %c4_i32 = arith.constant 4 : i32
    %62 = vector.broadcast %c4_i32 : i32 to vector<1x128xi32>
    %63 = arith.addi %16, %62 : vector<1x128xi32>
    %c0_i32_18 = arith.constant 0 : i32
    %64 = vector.broadcast %c0_i32_18 : i32 to vector<1x128xi32>
    %65 = arith.cmpi sge, %63, %64 : vector<1x128xi32>
    %c4_i32_19 = arith.constant 4 : i32
    %66 = vector.broadcast %c4_i32_19 : i32 to vector<1x128xi32>
    %67 = arith.addi %16, %66 : vector<1x128xi32>
    %c16_i32_20 = arith.constant 16 : i32
    %68 = vector.broadcast %c16_i32_20 : i32 to vector<1x128xi32>
    %69 = arith.cmpi slt, %67, %68 : vector<1x128xi32>
    %70 = arith.andi %65, %69 : vector<1x128xi1>
    %c0 = arith.constant 0 : index
    %c0_21 = arith.constant 0 : index
    %71 = vector.load %arg1[%c0, %c0_21] : memref<8x128xf32, #tpu.memory_space<vmem>>, vector<8x128xf32>
    %c1_i32_22 = arith.constant 1 : i32
    %72 = tpu.dynamic_rotate %71 by %c1_i32_22 dim 1 : vector<8x128xf32>, i32 -> vector<8x128xf32>
    %c0_i32_23 = arith.constant 0 : i32
    %73 = arith.sitofp %c0_i32_23 : i32 to f32
    %74 = vector.shape_cast %43 : vector<1x128xi1> to vector<1x128xi1>
    %75 = vector.broadcast %74 : vector<1x128xi1> to vector<8x128xi1>
    %76 = vector.broadcast %73 : f32 to vector<8x128xf32>
    %77 = arith.select %75, %72, %76 : vector<8x128xi1>, vector<8x128xf32>
    %c0_24 = arith.constant 0 : index
    %c0_25 = arith.constant 0 : index
    %c0_26 = arith.constant 0 : index
    %78 = vector.load %arg2[%c0_24, %c0_25, %c0_26] : memref<3x8x8xf32, #tpu.memory_space<vmem>>, vector<1x8x8xf32>
    %79 = vector.shape_cast %78 : vector<1x8x8xf32> to vector<8x8xf32>
    %cst = arith.constant dense<0.000000e+00> : vector<8x128xf32>
    %80 = tpu.matmul %79, %77, %cst {dimension_numbers = #tpu.dot_dimension_numbers<[1], [0], [0], [1], [0, 0, 1, 1], [], []>} : vector<8x8xf32>, vector<8x128xf32>, vector<8x128xf32> -> vector<8x128xf32>
    %c1 = arith.constant 1 : index
    %c0_27 = arith.constant 0 : index
    %c0_28 = arith.constant 0 : index
    %81 = vector.load %arg2[%c1, %c0_27, %c0_28] : memref<3x8x8xf32, #tpu.memory_space<vmem>>, vector<1x8x8xf32>
    %82 = vector.shape_cast %81 : vector<1x8x8xf32> to vector<8x8xf32>
    %cst_29 = arith.constant dense<0.000000e+00> : vector<8x128xf32>
    %83 = tpu.matmul %82, %71, %cst_29 {dimension_numbers = #tpu.dot_dimension_numbers<[1], [0], [0], [1], [0, 0, 1, 1], [], []>} : vector<8x8xf32>, vector<8x128xf32>, vector<8x128xf32> -> vector<8x128xf32>
    %84 = arith.addf %80, %83 : vector<8x128xf32>
    %c127_i32 = arith.constant 127 : i32
    %85 = tpu.dynamic_rotate %71 by %c127_i32 dim 1 : vector<8x128xf32>, i32 -> vector<8x128xf32>
    %c0_i32_30 = arith.constant 0 : i32
    %86 = arith.sitofp %c0_i32_30 : i32 to f32
    %87 = vector.shape_cast %52 : vector<1x128xi1> to vector<1x128xi1>
    %88 = vector.broadcast %87 : vector<1x128xi1> to vector<8x128xi1>
    %89 = vector.broadcast %86 : f32 to vector<8x128xf32>
    %90 = arith.select %88, %85, %89 : vector<8x128xi1>, vector<8x128xf32>
    %c2 = arith.constant 2 : index
    %c0_31 = arith.constant 0 : index
    %c0_32 = arith.constant 0 : index
    %91 = vector.load %arg2[%c2, %c0_31, %c0_32] : memref<3x8x8xf32, #tpu.memory_space<vmem>>, vector<1x8x8xf32>
    %92 = vector.shape_cast %91 : vector<1x8x8xf32> to vector<8x8xf32>
    %cst_33 = arith.constant dense<0.000000e+00> : vector<8x128xf32>
    %93 = tpu.matmul %92, %90, %cst_33 {dimension_numbers = #tpu.dot_dimension_numbers<[1], [0], [0], [1], [0, 0, 1, 1], [], []>} : vector<8x8xf32>, vector<8x128xf32>, vector<8x128xf32> -> vector<8x128xf32>
    %94 = arith.addf %84, %93 : vector<8x128xf32>
    %c0_34 = arith.constant 0 : index
    %c0_35 = arith.constant 0 : index
    %95 = vector.load %arg3[%c0_34, %c0_35] : memref<8x1xf32, #tpu.memory_space<vmem>>, vector<8x1xf32>
    %96 = vector.broadcast %95 : vector<8x1xf32> to vector<8x128xf32>
    %97 = arith.addf %94, %96 : vector<8x128xf32>
    %cst_36 = arith.constant 0.000000e+00 : f32
    %98 = vector.broadcast %cst_36 : f32 to vector<8x128xf32>
    %99 = arith.maximumf %97, %98 : vector<8x128xf32>
    %c1_i32_37 = arith.constant 1 : i32
    %100 = tpu.dynamic_rotate %99 by %c1_i32_37 dim 1 : vector<8x128xf32>, i32 -> vector<8x128xf32>
    %c0_i32_38 = arith.constant 0 : i32
    %101 = arith.sitofp %c0_i32_38 : i32 to f32
    %102 = vector.shape_cast %43 : vector<1x128xi1> to vector<1x128xi1>
    %103 = vector.broadcast %102 : vector<1x128xi1> to vector<8x128xi1>
    %104 = vector.broadcast %101 : f32 to vector<8x128xf32>
    %105 = arith.select %103, %100, %104 : vector<8x128xi1>, vector<8x128xf32>
    %c0_39 = arith.constant 0 : index
    %c0_40 = arith.constant 0 : index
    %c0_41 = arith.constant 0 : index
    %106 = vector.load %arg4[%c0_39, %c0_40, %c0_41] : memref<3x8x8xf32, #tpu.memory_space<vmem>>, vector<1x8x8xf32>
    %107 = vector.shape_cast %106 : vector<1x8x8xf32> to vector<8x8xf32>
    %cst_42 = arith.constant dense<0.000000e+00> : vector<8x128xf32>
    %108 = tpu.matmul %107, %105, %cst_42 {dimension_numbers = #tpu.dot_dimension_numbers<[1], [0], [0], [1], [0, 0, 1, 1], [], []>} : vector<8x8xf32>, vector<8x128xf32>, vector<8x128xf32> -> vector<8x128xf32>
    %c1_43 = arith.constant 1 : index
    %c0_44 = arith.constant 0 : index
    %c0_45 = arith.constant 0 : index
    %109 = vector.load %arg4[%c1_43, %c0_44, %c0_45] : memref<3x8x8xf32, #tpu.memory_space<vmem>>, vector<1x8x8xf32>
    %110 = vector.shape_cast %109 : vector<1x8x8xf32> to vector<8x8xf32>
    %cst_46 = arith.constant dense<0.000000e+00> : vector<8x128xf32>
    %111 = tpu.matmul %110, %99, %cst_46 {dimension_numbers = #tpu.dot_dimension_numbers<[1], [0], [0], [1], [0, 0, 1, 1], [], []>} : vector<8x8xf32>, vector<8x128xf32>, vector<8x128xf32> -> vector<8x128xf32>
    %112 = arith.addf %108, %111 : vector<8x128xf32>
    %c127_i32_47 = arith.constant 127 : i32
    %113 = tpu.dynamic_rotate %99 by %c127_i32_47 dim 1 : vector<8x128xf32>, i32 -> vector<8x128xf32>
    %c0_i32_48 = arith.constant 0 : i32
    %114 = arith.sitofp %c0_i32_48 : i32 to f32
    %115 = vector.shape_cast %52 : vector<1x128xi1> to vector<1x128xi1>
    %116 = vector.broadcast %115 : vector<1x128xi1> to vector<8x128xi1>
    %117 = vector.broadcast %114 : f32 to vector<8x128xf32>
    %118 = arith.select %116, %113, %117 : vector<8x128xi1>, vector<8x128xf32>
    %c2_49 = arith.constant 2 : index
    %c0_50 = arith.constant 0 : index
    %c0_51 = arith.constant 0 : index
    %119 = vector.load %arg4[%c2_49, %c0_50, %c0_51] : memref<3x8x8xf32, #tpu.memory_space<vmem>>, vector<1x8x8xf32>
    %120 = vector.shape_cast %119 : vector<1x8x8xf32> to vector<8x8xf32>
    %cst_52 = arith.constant dense<0.000000e+00> : vector<8x128xf32>
    %121 = tpu.matmul %120, %118, %cst_52 {dimension_numbers = #tpu.dot_dimension_numbers<[1], [0], [0], [1], [0, 0, 1, 1], [], []>} : vector<8x8xf32>, vector<8x128xf32>, vector<8x128xf32> -> vector<8x128xf32>
    %122 = arith.addf %112, %121 : vector<8x128xf32>
    %c0_53 = arith.constant 0 : index
    %c0_54 = arith.constant 0 : index
    %123 = vector.load %arg5[%c0_53, %c0_54] : memref<8x1xf32, #tpu.memory_space<vmem>>, vector<8x1xf32>
    %124 = vector.broadcast %123 : vector<8x1xf32> to vector<8x128xf32>
    %125 = arith.addf %122, %124 : vector<8x128xf32>
    %c0_55 = arith.constant 0 : index
    %c0_56 = arith.constant 0 : index
    %126 = vector.load %arg6[%c0_55, %c0_56] : memref<8x8xf32, #tpu.memory_space<vmem>>, vector<8x8xf32>
    %cst_57 = arith.constant dense<0.000000e+00> : vector<8x128xf32>
    %127 = tpu.matmul %126, %71, %cst_57 {dimension_numbers = #tpu.dot_dimension_numbers<[1], [0], [0], [1], [0, 0, 1, 1], [], []>} : vector<8x8xf32>, vector<8x128xf32>, vector<8x128xf32> -> vector<8x128xf32>
    %c0_58 = arith.constant 0 : index
    %c0_59 = arith.constant 0 : index
    %128 = vector.load %arg7[%c0_58, %c0_59] : memref<8x1xf32, #tpu.memory_space<vmem>>, vector<8x1xf32>
    %129 = vector.broadcast %128 : vector<8x1xf32> to vector<8x128xf32>
    %130 = arith.addf %127, %129 : vector<8x128xf32>
    %131 = arith.addf %125, %130 : vector<8x128xf32>
    %cst_60 = arith.constant 0.000000e+00 : f32
    %132 = vector.broadcast %cst_60 : f32 to vector<8x128xf32>
    %133 = arith.maximumf %131, %132 : vector<8x128xf32>
    %c2_i32_61 = arith.constant 2 : i32
    %134 = tpu.dynamic_rotate %133 by %c2_i32_61 dim 1 : vector<8x128xf32>, i32 -> vector<8x128xf32>
    %c0_i32_62 = arith.constant 0 : i32
    %135 = arith.sitofp %c0_i32_62 : i32 to f32
    %136 = vector.shape_cast %34 : vector<1x128xi1> to vector<1x128xi1>
    %137 = vector.broadcast %136 : vector<1x128xi1> to vector<8x128xi1>
    %138 = vector.broadcast %135 : f32 to vector<8x128xf32>
    %139 = arith.select %137, %134, %138 : vector<8x128xi1>, vector<8x128xf32>
    %c0_63 = arith.constant 0 : index
    %c0_64 = arith.constant 0 : index
    %c0_65 = arith.constant 0 : index
    %140 = vector.load %arg8[%c0_63, %c0_64, %c0_65] : memref<3x8x8xf32, #tpu.memory_space<vmem>>, vector<1x8x8xf32>
    %141 = vector.shape_cast %140 : vector<1x8x8xf32> to vector<8x8xf32>
    %cst_66 = arith.constant dense<0.000000e+00> : vector<8x128xf32>
    %142 = tpu.matmul %141, %139, %cst_66 {dimension_numbers = #tpu.dot_dimension_numbers<[1], [0], [0], [1], [0, 0, 1, 1], [], []>} : vector<8x8xf32>, vector<8x128xf32>, vector<8x128xf32> -> vector<8x128xf32>
    %c1_67 = arith.constant 1 : index
    %c0_68 = arith.constant 0 : index
    %c0_69 = arith.constant 0 : index
    %143 = vector.load %arg8[%c1_67, %c0_68, %c0_69] : memref<3x8x8xf32, #tpu.memory_space<vmem>>, vector<1x8x8xf32>
    %144 = vector.shape_cast %143 : vector<1x8x8xf32> to vector<8x8xf32>
    %cst_70 = arith.constant dense<0.000000e+00> : vector<8x128xf32>
    %145 = tpu.matmul %144, %133, %cst_70 {dimension_numbers = #tpu.dot_dimension_numbers<[1], [0], [0], [1], [0, 0, 1, 1], [], []>} : vector<8x8xf32>, vector<8x128xf32>, vector<8x128xf32> -> vector<8x128xf32>
    %146 = arith.addf %142, %145 : vector<8x128xf32>
    %c126_i32 = arith.constant 126 : i32
    %147 = tpu.dynamic_rotate %133 by %c126_i32 dim 1 : vector<8x128xf32>, i32 -> vector<8x128xf32>
    %c0_i32_71 = arith.constant 0 : i32
    %148 = arith.sitofp %c0_i32_71 : i32 to f32
    %149 = vector.shape_cast %61 : vector<1x128xi1> to vector<1x128xi1>
    %150 = vector.broadcast %149 : vector<1x128xi1> to vector<8x128xi1>
    %151 = vector.broadcast %148 : f32 to vector<8x128xf32>
    %152 = arith.select %150, %147, %151 : vector<8x128xi1>, vector<8x128xf32>
    %c2_72 = arith.constant 2 : index
    %c0_73 = arith.constant 0 : index
    %c0_74 = arith.constant 0 : index
    %153 = vector.load %arg8[%c2_72, %c0_73, %c0_74] : memref<3x8x8xf32, #tpu.memory_space<vmem>>, vector<1x8x8xf32>
    %154 = vector.shape_cast %153 : vector<1x8x8xf32> to vector<8x8xf32>
    %cst_75 = arith.constant dense<0.000000e+00> : vector<8x128xf32>
    %155 = tpu.matmul %154, %152, %cst_75 {dimension_numbers = #tpu.dot_dimension_numbers<[1], [0], [0], [1], [0, 0, 1, 1], [], []>} : vector<8x8xf32>, vector<8x128xf32>, vector<8x128xf32> -> vector<8x128xf32>
    %156 = arith.addf %146, %155 : vector<8x128xf32>
    %c0_76 = arith.constant 0 : index
    %c0_77 = arith.constant 0 : index
    %157 = vector.load %arg9[%c0_76, %c0_77] : memref<8x1xf32, #tpu.memory_space<vmem>>, vector<8x1xf32>
    %158 = vector.broadcast %157 : vector<8x1xf32> to vector<8x128xf32>
    %159 = arith.addf %156, %158 : vector<8x128xf32>
    %cst_78 = arith.constant 0.000000e+00 : f32
    %160 = vector.broadcast %cst_78 : f32 to vector<8x128xf32>
    %161 = arith.maximumf %159, %160 : vector<8x128xf32>
    %c2_i32_79 = arith.constant 2 : i32
    %162 = tpu.dynamic_rotate %161 by %c2_i32_79 dim 1 : vector<8x128xf32>, i32 -> vector<8x128xf32>
    %c0_i32_80 = arith.constant 0 : i32
    %163 = arith.sitofp %c0_i32_80 : i32 to f32
    %164 = vector.shape_cast %34 : vector<1x128xi1> to vector<1x128xi1>
    %165 = vector.broadcast %164 : vector<1x128xi1> to vector<8x128xi1>
    %166 = vector.broadcast %163 : f32 to vector<8x128xf32>
    %167 = arith.select %165, %162, %166 : vector<8x128xi1>, vector<8x128xf32>
    %c0_81 = arith.constant 0 : index
    %c0_82 = arith.constant 0 : index
    %c0_83 = arith.constant 0 : index
    %168 = vector.load %arg10[%c0_81, %c0_82, %c0_83] : memref<3x8x8xf32, #tpu.memory_space<vmem>>, vector<1x8x8xf32>
    %169 = vector.shape_cast %168 : vector<1x8x8xf32> to vector<8x8xf32>
    %cst_84 = arith.constant dense<0.000000e+00> : vector<8x128xf32>
    %170 = tpu.matmul %169, %167, %cst_84 {dimension_numbers = #tpu.dot_dimension_numbers<[1], [0], [0], [1], [0, 0, 1, 1], [], []>} : vector<8x8xf32>, vector<8x128xf32>, vector<8x128xf32> -> vector<8x128xf32>
    %c1_85 = arith.constant 1 : index
    %c0_86 = arith.constant 0 : index
    %c0_87 = arith.constant 0 : index
    %171 = vector.load %arg10[%c1_85, %c0_86, %c0_87] : memref<3x8x8xf32, #tpu.memory_space<vmem>>, vector<1x8x8xf32>
    %172 = vector.shape_cast %171 : vector<1x8x8xf32> to vector<8x8xf32>
    %cst_88 = arith.constant dense<0.000000e+00> : vector<8x128xf32>
    %173 = tpu.matmul %172, %161, %cst_88 {dimension_numbers = #tpu.dot_dimension_numbers<[1], [0], [0], [1], [0, 0, 1, 1], [], []>} : vector<8x8xf32>, vector<8x128xf32>, vector<8x128xf32> -> vector<8x128xf32>
    %174 = arith.addf %170, %173 : vector<8x128xf32>
    %c126_i32_89 = arith.constant 126 : i32
    %175 = tpu.dynamic_rotate %161 by %c126_i32_89 dim 1 : vector<8x128xf32>, i32 -> vector<8x128xf32>
    %c0_i32_90 = arith.constant 0 : i32
    %176 = arith.sitofp %c0_i32_90 : i32 to f32
    %177 = vector.shape_cast %61 : vector<1x128xi1> to vector<1x128xi1>
    %178 = vector.broadcast %177 : vector<1x128xi1> to vector<8x128xi1>
    %179 = vector.broadcast %176 : f32 to vector<8x128xf32>
    %180 = arith.select %178, %175, %179 : vector<8x128xi1>, vector<8x128xf32>
    %c2_91 = arith.constant 2 : index
    %c0_92 = arith.constant 0 : index
    %c0_93 = arith.constant 0 : index
    %181 = vector.load %arg10[%c2_91, %c0_92, %c0_93] : memref<3x8x8xf32, #tpu.memory_space<vmem>>, vector<1x8x8xf32>
    %182 = vector.shape_cast %181 : vector<1x8x8xf32> to vector<8x8xf32>
    %cst_94 = arith.constant dense<0.000000e+00> : vector<8x128xf32>
    %183 = tpu.matmul %182, %180, %cst_94 {dimension_numbers = #tpu.dot_dimension_numbers<[1], [0], [0], [1], [0, 0, 1, 1], [], []>} : vector<8x8xf32>, vector<8x128xf32>, vector<8x128xf32> -> vector<8x128xf32>
    %184 = arith.addf %174, %183 : vector<8x128xf32>
    %c0_95 = arith.constant 0 : index
    %c0_96 = arith.constant 0 : index
    %185 = vector.load %arg11[%c0_95, %c0_96] : memref<8x1xf32, #tpu.memory_space<vmem>>, vector<8x1xf32>
    %186 = vector.broadcast %185 : vector<8x1xf32> to vector<8x128xf32>
    %187 = arith.addf %184, %186 : vector<8x128xf32>
    %188 = arith.addf %187, %133 : vector<8x128xf32>
    %cst_97 = arith.constant 0.000000e+00 : f32
    %189 = vector.broadcast %cst_97 : f32 to vector<8x128xf32>
    %190 = arith.maximumf %188, %189 : vector<8x128xf32>
    %c4_i32_98 = arith.constant 4 : i32
    %191 = tpu.dynamic_rotate %190 by %c4_i32_98 dim 1 : vector<8x128xf32>, i32 -> vector<8x128xf32>
    %c0_i32_99 = arith.constant 0 : i32
    %192 = arith.sitofp %c0_i32_99 : i32 to f32
    %193 = vector.shape_cast %25 : vector<1x128xi1> to vector<1x128xi1>
    %194 = vector.broadcast %193 : vector<1x128xi1> to vector<8x128xi1>
    %195 = vector.broadcast %192 : f32 to vector<8x128xf32>
    %196 = arith.select %194, %191, %195 : vector<8x128xi1>, vector<8x128xf32>
    %c0_100 = arith.constant 0 : index
    %c0_101 = arith.constant 0 : index
    %c0_102 = arith.constant 0 : index
    %197 = vector.load %arg12[%c0_100, %c0_101, %c0_102] : memref<3x8x8xf32, #tpu.memory_space<vmem>>, vector<1x8x8xf32>
    %198 = vector.shape_cast %197 : vector<1x8x8xf32> to vector<8x8xf32>
    %cst_103 = arith.constant dense<0.000000e+00> : vector<8x128xf32>
    %199 = tpu.matmul %198, %196, %cst_103 {dimension_numbers = #tpu.dot_dimension_numbers<[1], [0], [0], [1], [0, 0, 1, 1], [], []>} : vector<8x8xf32>, vector<8x128xf32>, vector<8x128xf32> -> vector<8x128xf32>
    %c1_104 = arith.constant 1 : index
    %c0_105 = arith.constant 0 : index
    %c0_106 = arith.constant 0 : index
    %200 = vector.load %arg12[%c1_104, %c0_105, %c0_106] : memref<3x8x8xf32, #tpu.memory_space<vmem>>, vector<1x8x8xf32>
    %201 = vector.shape_cast %200 : vector<1x8x8xf32> to vector<8x8xf32>
    %cst_107 = arith.constant dense<0.000000e+00> : vector<8x128xf32>
    %202 = tpu.matmul %201, %190, %cst_107 {dimension_numbers = #tpu.dot_dimension_numbers<[1], [0], [0], [1], [0, 0, 1, 1], [], []>} : vector<8x8xf32>, vector<8x128xf32>, vector<8x128xf32> -> vector<8x128xf32>
    %203 = arith.addf %199, %202 : vector<8x128xf32>
    %c124_i32 = arith.constant 124 : i32
    %204 = tpu.dynamic_rotate %190 by %c124_i32 dim 1 : vector<8x128xf32>, i32 -> vector<8x128xf32>
    %c0_i32_108 = arith.constant 0 : i32
    %205 = arith.sitofp %c0_i32_108 : i32 to f32
    %206 = vector.shape_cast %70 : vector<1x128xi1> to vector<1x128xi1>
    %207 = vector.broadcast %206 : vector<1x128xi1> to vector<8x128xi1>
    %208 = vector.broadcast %205 : f32 to vector<8x128xf32>
    %209 = arith.select %207, %204, %208 : vector<8x128xi1>, vector<8x128xf32>
    %c2_109 = arith.constant 2 : index
    %c0_110 = arith.constant 0 : index
    %c0_111 = arith.constant 0 : index
    %210 = vector.load %arg12[%c2_109, %c0_110, %c0_111] : memref<3x8x8xf32, #tpu.memory_space<vmem>>, vector<1x8x8xf32>
    %211 = vector.shape_cast %210 : vector<1x8x8xf32> to vector<8x8xf32>
    %cst_112 = arith.constant dense<0.000000e+00> : vector<8x128xf32>
    %212 = tpu.matmul %211, %209, %cst_112 {dimension_numbers = #tpu.dot_dimension_numbers<[1], [0], [0], [1], [0, 0, 1, 1], [], []>} : vector<8x8xf32>, vector<8x128xf32>, vector<8x128xf32> -> vector<8x128xf32>
    %213 = arith.addf %203, %212 : vector<8x128xf32>
    %c0_113 = arith.constant 0 : index
    %c0_114 = arith.constant 0 : index
    %214 = vector.load %arg13[%c0_113, %c0_114] : memref<8x1xf32, #tpu.memory_space<vmem>>, vector<8x1xf32>
    %215 = vector.broadcast %214 : vector<8x1xf32> to vector<8x128xf32>
    %216 = arith.addf %213, %215 : vector<8x128xf32>
    %cst_115 = arith.constant 0.000000e+00 : f32
    %217 = vector.broadcast %cst_115 : f32 to vector<8x128xf32>
    %218 = arith.maximumf %216, %217 : vector<8x128xf32>
    %c4_i32_116 = arith.constant 4 : i32
    %219 = tpu.dynamic_rotate %218 by %c4_i32_116 dim 1 : vector<8x128xf32>, i32 -> vector<8x128xf32>
    %c0_i32_117 = arith.constant 0 : i32
    %220 = arith.sitofp %c0_i32_117 : i32 to f32
    %221 = vector.shape_cast %25 : vector<1x128xi1> to vector<1x128xi1>
    %222 = vector.broadcast %221 : vector<1x128xi1> to vector<8x128xi1>
    %223 = vector.broadcast %220 : f32 to vector<8x128xf32>
    %224 = arith.select %222, %219, %223 : vector<8x128xi1>, vector<8x128xf32>
    %c0_118 = arith.constant 0 : index
    %c0_119 = arith.constant 0 : index
    %c0_120 = arith.constant 0 : index
    %225 = vector.load %arg14[%c0_118, %c0_119, %c0_120] : memref<3x8x8xf32, #tpu.memory_space<vmem>>, vector<1x8x8xf32>
    %226 = vector.shape_cast %225 : vector<1x8x8xf32> to vector<8x8xf32>
    %cst_121 = arith.constant dense<0.000000e+00> : vector<8x128xf32>
    %227 = tpu.matmul %226, %224, %cst_121 {dimension_numbers = #tpu.dot_dimension_numbers<[1], [0], [0], [1], [0, 0, 1, 1], [], []>} : vector<8x8xf32>, vector<8x128xf32>, vector<8x128xf32> -> vector<8x128xf32>
    %c1_122 = arith.constant 1 : index
    %c0_123 = arith.constant 0 : index
    %c0_124 = arith.constant 0 : index
    %228 = vector.load %arg14[%c1_122, %c0_123, %c0_124] : memref<3x8x8xf32, #tpu.memory_space<vmem>>, vector<1x8x8xf32>
    %229 = vector.shape_cast %228 : vector<1x8x8xf32> to vector<8x8xf32>
    %cst_125 = arith.constant dense<0.000000e+00> : vector<8x128xf32>
    %230 = tpu.matmul %229, %218, %cst_125 {dimension_numbers = #tpu.dot_dimension_numbers<[1], [0], [0], [1], [0, 0, 1, 1], [], []>} : vector<8x8xf32>, vector<8x128xf32>, vector<8x128xf32> -> vector<8x128xf32>
    %231 = arith.addf %227, %230 : vector<8x128xf32>
    %c124_i32_126 = arith.constant 124 : i32
    %232 = tpu.dynamic_rotate %218 by %c124_i32_126 dim 1 : vector<8x128xf32>, i32 -> vector<8x128xf32>
    %c0_i32_127 = arith.constant 0 : i32
    %233 = arith.sitofp %c0_i32_127 : i32 to f32
    %234 = vector.shape_cast %70 : vector<1x128xi1> to vector<1x128xi1>
    %235 = vector.broadcast %234 : vector<1x128xi1> to vector<8x128xi1>
    %236 = vector.broadcast %233 : f32 to vector<8x128xf32>
    %237 = arith.select %235, %232, %236 : vector<8x128xi1>, vector<8x128xf32>
    %c2_128 = arith.constant 2 : index
    %c0_129 = arith.constant 0 : index
    %c0_130 = arith.constant 0 : index
    %238 = vector.load %arg14[%c2_128, %c0_129, %c0_130] : memref<3x8x8xf32, #tpu.memory_space<vmem>>, vector<1x8x8xf32>
    %239 = vector.shape_cast %238 : vector<1x8x8xf32> to vector<8x8xf32>
    %cst_131 = arith.constant dense<0.000000e+00> : vector<8x128xf32>
    %240 = tpu.matmul %239, %237, %cst_131 {dimension_numbers = #tpu.dot_dimension_numbers<[1], [0], [0], [1], [0, 0, 1, 1], [], []>} : vector<8x8xf32>, vector<8x128xf32>, vector<8x128xf32> -> vector<8x128xf32>
    %241 = arith.addf %231, %240 : vector<8x128xf32>
    %c0_132 = arith.constant 0 : index
    %c0_133 = arith.constant 0 : index
    %242 = vector.load %arg15[%c0_132, %c0_133] : memref<8x1xf32, #tpu.memory_space<vmem>>, vector<8x1xf32>
    %243 = vector.broadcast %242 : vector<8x1xf32> to vector<8x128xf32>
    %244 = arith.addf %241, %243 : vector<8x128xf32>
    %c0_134 = arith.constant 0 : index
    %c0_135 = arith.constant 0 : index
    %245 = vector.load %arg16[%c0_134, %c0_135] : memref<8x8xf32, #tpu.memory_space<vmem>>, vector<8x8xf32>
    %cst_136 = arith.constant dense<0.000000e+00> : vector<8x128xf32>
    %246 = tpu.matmul %245, %190, %cst_136 {dimension_numbers = #tpu.dot_dimension_numbers<[1], [0], [0], [1], [0, 0, 1, 1], [], []>} : vector<8x8xf32>, vector<8x128xf32>, vector<8x128xf32> -> vector<8x128xf32>
    %c0_137 = arith.constant 0 : index
    %c0_138 = arith.constant 0 : index
    %247 = vector.load %arg17[%c0_137, %c0_138] : memref<8x1xf32, #tpu.memory_space<vmem>>, vector<8x1xf32>
    %248 = vector.broadcast %247 : vector<8x1xf32> to vector<8x128xf32>
    %249 = arith.addf %246, %248 : vector<8x128xf32>
    %250 = arith.addf %244, %249 : vector<8x128xf32>
    %cst_139 = arith.constant 0.000000e+00 : f32
    %251 = vector.broadcast %cst_139 : f32 to vector<8x128xf32>
    %252 = arith.maximumf %250, %251 : vector<8x128xf32>
    %c0_140 = arith.constant 0 : index
    %c0_141 = arith.constant 0 : index
    %253 = vector.load %arg18[%c0_140, %c0_141] : memref<8x128xf32, #tpu.memory_space<vmem>>, vector<8x128xf32>
    tpu.vector_store %arg18[%c0_140, %c0_141], %252 {strides = array<i32>} : memref<8x128xf32, #tpu.memory_space<vmem>>, vector<8x128xf32>,
    return
  }
  func.func @transform_0(%arg0: i32) -> (i32, i32) {
    %c0_i32 = arith.constant 0 : i32
    %c0_i32_0 = arith.constant 0 : i32
    return %c0_i32, %arg0 : i32, i32
  }
  func.func @transform_1(%arg0: i32) -> (i32, i32, i32) {
    %c0_i32 = arith.constant 0 : i32
    %c0_i32_0 = arith.constant 0 : i32
    %c0_i32_1 = arith.constant 0 : i32
    %c0_i32_2 = arith.constant 0 : i32
    return %c0_i32, %c0_i32_0, %c0_i32_1 : i32, i32, i32
  }
  func.func @transform_2(%arg0: i32) -> (i32, i32) {
    %c0_i32 = arith.constant 0 : i32
    %c0_i32_0 = arith.constant 0 : i32
    %c0_i32_1 = arith.constant 0 : i32
    return %c0_i32, %c0_i32_0 : i32, i32
  }
  func.func @transform_3(%arg0: i32) -> (i32, i32, i32) {
    %c0_i32 = arith.constant 0 : i32
    %c0_i32_0 = arith.constant 0 : i32
    %c0_i32_1 = arith.constant 0 : i32
    %c0_i32_2 = arith.constant 0 : i32
    return %c0_i32, %c0_i32_0, %c0_i32_1 : i32, i32, i32
  }
  func.func @transform_4(%arg0: i32) -> (i32, i32) {
    %c0_i32 = arith.constant 0 : i32
    %c0_i32_0 = arith.constant 0 : i32
    %c0_i32_1 = arith.constant 0 : i32
    return %c0_i32, %c0_i32_0 : i32, i32
  }
  func.func @transform_5(%arg0: i32) -> (i32, i32) {
    %c0_i32 = arith.constant 0 : i32
    %c0_i32_0 = arith.constant 0 : i32
    %c0_i32_1 = arith.constant 0 : i32
    return %c0_i32, %c0_i32_0 : i32, i32
  }
  func.func @transform_6(%arg0: i32) -> (i32, i32) {
    %c0_i32 = arith.constant 0 : i32
    %c0_i32_0 = arith.constant 0 : i32
    %c0_i32_1 = arith.constant 0 : i32
    return %c0_i32, %c0_i32_0 : i32, i32
  }
  func.func @transform_7(%arg0: i32) -> (i32, i32, i32) {
    %c0_i32 = arith.constant 0 : i32
    %c0_i32_0 = arith.constant 0 : i32
    %c0_i32_1 = arith.constant 0 : i32
    %c0_i32_2 = arith.constant 0 : i32
    return %c0_i32, %c0_i32_0, %c0_i32_1 : i32, i32, i32
  }
  func.func @transform_8(%arg0: i32) -> (i32, i32) {
    %c0_i32 = arith.constant 0 : i32
    %c0_i32_0 = arith.constant 0 : i32
    %c0_i32_1 = arith.constant 0 : i32
    return %c0_i32, %c0_i32_0 : i32, i32
  }
  func.func @transform_9(%arg0: i32) -> (i32, i32, i32) {
    %c0_i32 = arith.constant 0 : i32
    %c0_i32_0 = arith.constant 0 : i32
    %c0_i32_1 = arith.constant 0 : i32
    %c0_i32_2 = arith.constant 0 : i32
    return %c0_i32, %c0_i32_0, %c0_i32_1 : i32, i32, i32
  }
  func.func @transform_10(%arg0: i32) -> (i32, i32) {
    %c0_i32 = arith.constant 0 : i32
    %c0_i32_0 = arith.constant 0 : i32
    %c0_i32_1 = arith.constant 0 : i32
    return %c0_i32, %c0_i32_0 : i32, i32
  }
  func.func @transform_11(%arg0: i32) -> (i32, i32, i32) {
    %c0_i32 = arith.constant 0 : i32
    %c0_i32_0 = arith.constant 0 : i32
    %c0_i32_1 = arith.constant 0 : i32
    %c0_i32_2 = arith.constant 0 : i32
    return %c0_i32, %c0_i32_0, %c0_i32_1 : i32, i32, i32
  }
  func.func @transform_12(%arg0: i32) -> (i32, i32) {
    %c0_i32 = arith.constant 0 : i32
    %c0_i32_0 = arith.constant 0 : i32
    %c0_i32_1 = arith.constant 0 : i32
    return %c0_i32, %c0_i32_0 : i32, i32
  }
  func.func @transform_13(%arg0: i32) -> (i32, i32, i32) {
    %c0_i32 = arith.constant 0 : i32
    %c0_i32_0 = arith.constant 0 : i32
    %c0_i32_1 = arith.constant 0 : i32
    %c0_i32_2 = arith.constant 0 : i32
    return %c0_i32, %c0_i32_0, %c0_i32_1 : i32, i32, i32
  }
  func.func @transform_14(%arg0: i32) -> (i32, i32) {
    %c0_i32 = arith.constant 0 : i32
    %c0_i32_0 = arith.constant 0 : i32
    %c0_i32_1 = arith.constant 0 : i32
    return %c0_i32, %c0_i32_0 : i32, i32
  }
  func.func @transform_15(%arg0: i32) -> (i32, i32) {
    %c0_i32 = arith.constant 0 : i32
    %c0_i32_0 = arith.constant 0 : i32
    %c0_i32_1 = arith.constant 0 : i32
    return %c0_i32, %c0_i32_0 : i32, i32
  }
  func.func @transform_16(%arg0: i32) -> (i32, i32) {
    %c0_i32 = arith.constant 0 : i32
    %c0_i32_0 = arith.constant 0 : i32
    %c0_i32_1 = arith.constant 0 : i32
    return %c0_i32, %c0_i32_0 : i32, i32
  }
  func.func @transform_17(%arg0: i32) -> (i32, i32) {
    %c0_i32 = arith.constant 0 : i32
    %c0_i32_0 = arith.constant 0 : i32
    return %c0_i32, %arg0 : i32, i32
  }
}

module attributes {stable_mosaic.version = 11 : i64} {
  func.func @_tcn_fused_kernel(%arg0: i32, %arg1: memref<8x128xf32, #tpu.memory_space<vmem>>, %arg2: memref<3x8x8xf32, #tpu.memory_space<vmem>>, %arg3: memref<8x1xf32, #tpu.memory_space<vmem>>, %arg4: memref<3x8x8xf32, #tpu.memory_space<vmem>>, %arg5: memref<8x1xf32, #tpu.memory_space<vmem>>, %arg6: memref<8x8xf32, #tpu.memory_space<vmem>>, %arg7: memref<8x1xf32, #tpu.memory_space<vmem>>, %arg8: memref<3x8x8xf32, #tpu.memory_space<vmem>>, %arg9: memref<8x1xf32, #tpu.memory_space<vmem>>, %arg10: memref<3x8x8xf32, #tpu.memory_space<vmem>>, %arg11: memref<8x1xf32, #tpu.memory_space<vmem>>, %arg12: memref<3x8x8xf32, #tpu.memory_space<vmem>>, %arg13: memref<8x1xf32, #tpu.memory_space<vmem>>, %arg14: memref<3x8x8xf32, #tpu.memory_space<vmem>>, %arg15: memref<8x1xf32, #tpu.memory_space<vmem>>, %arg16: memref<8x8xf32, #tpu.memory_space<vmem>>, %arg17: memref<8x1xf32, #tpu.memory_space<vmem>>, %arg18: memref<8x128xf32, #tpu.memory_space<vmem>>) attributes {dimension_semantics = [#tpu.dimension_semantics<parallel>], iteration_bounds = array<i64: 2>, scalar_prefetch = 0 : i64, scratch_operands = 0 : i64, tpu.core_type = #tpu.core_type<tc>, window_params = [{transform_indices = @transform_0, window_bounds = array<i64: 8, 128>}, {pipeline_mode = #tpu.pipeline_mode<synchronous>, transform_indices = @transform_1, window_bounds = array<i64: 3, 8, 8>}, {pipeline_mode = #tpu.pipeline_mode<synchronous>, transform_indices = @transform_2, window_bounds = array<i64: 8, 1>}, {pipeline_mode = #tpu.pipeline_mode<synchronous>, transform_indices = @transform_3, window_bounds = array<i64: 3, 8, 8>}, {pipeline_mode = #tpu.pipeline_mode<synchronous>, transform_indices = @transform_4, window_bounds = array<i64: 8, 1>}, {pipeline_mode = #tpu.pipeline_mode<synchronous>, transform_indices = @transform_5, window_bounds = array<i64: 8, 8>}, {pipeline_mode = #tpu.pipeline_mode<synchronous>, transform_indices = @transform_6, window_bounds = array<i64: 8, 1>}, {pipeline_mode = #tpu.pipeline_mode<synchronous>, transform_indices = @transform_7, window_bounds = array<i64: 3, 8, 8>}, {pipeline_mode = #tpu.pipeline_mode<synchronous>, transform_indices = @transform_8, window_bounds = array<i64: 8, 1>}, {pipeline_mode = #tpu.pipeline_mode<synchronous>, transform_indices = @transform_9, window_bounds = array<i64: 3, 8, 8>}, {pipeline_mode = #tpu.pipeline_mode<synchronous>, transform_indices = @transform_10, window_bounds = array<i64: 8, 1>}, {pipeline_mode = #tpu.pipeline_mode<synchronous>, transform_indices = @transform_11, window_bounds = array<i64: 3, 8, 8>}, {pipeline_mode = #tpu.pipeline_mode<synchronous>, transform_indices = @transform_12, window_bounds = array<i64: 8, 1>}, {pipeline_mode = #tpu.pipeline_mode<synchronous>, transform_indices = @transform_13, window_bounds = array<i64: 3, 8, 8>}, {pipeline_mode = #tpu.pipeline_mode<synchronous>, transform_indices = @transform_14, window_bounds = array<i64: 8, 1>}, {pipeline_mode = #tpu.pipeline_mode<synchronous>, transform_indices = @transform_15, window_bounds = array<i64: 8, 8>}, {pipeline_mode = #tpu.pipeline_mode<synchronous>, transform_indices = @transform_16, window_bounds = array<i64: 8, 1>}, {transform_indices = @transform_17, window_bounds = array<i64: 8, 128>}]} {
    %0 = tpu.iota {dimensions = array<i32: 1>} : vector<1x128xi32>
    %c128_i32 = arith.constant 128 : i32
    %c0_i32 = arith.constant 0 : i32
    %1 = arith.cmpi eq, %c128_i32, %c0_i32 : i32
    %c1_i32 = arith.constant 1 : i32
    %2 = arith.select %1, %c1_i32, %c128_i32 : i32
    %3 = vector.broadcast %2 : i32 to vector<1x128xi32>
    %4 = arith.remsi %0, %3 : vector<1x128xi32>
    %c0_i32_0 = arith.constant 0 : i32
    %5 = vector.broadcast %c0_i32_0 : i32 to vector<1x128xi32>
    %6 = arith.cmpi ne, %4, %5 : vector<1x128xi32>
    %c0_i32_1 = arith.constant 0 : i32
    %7 = vector.broadcast %c0_i32_1 : i32 to vector<1x128xi32>
    %8 = arith.cmpi slt, %4, %7 : vector<1x128xi32>
    %c0_i32_2 = arith.constant 0 : i32
    %9 = arith.cmpi slt, %2, %c0_i32_2 : i32
    %10 = vector.broadcast %9 : i1 to vector<1x128xi1>
    %11 = vector.broadcast %10 : vector<1x128xi1> to vector<1x128xi1>
    %12 = arith.xori %8, %11 : vector<1x128xi1>
    %13 = arith.andi %12, %6 : vector<1x128xi1>
    %14 = vector.broadcast %2 : i32 to vector<1x128xi32>
    %15 = arith.addi %4, %14 : vector<1x128xi32>
    %16 = arith.select %13, %15, %4 : vector<1x128xi1>, vector<1x128xi32>
    %c-4_i32 = arith.constant -4 : i32
    %17 = vector.broadcast %c-4_i32 : i32 to vector<1x128xi32>
    %18 = arith.addi %16, %17 : vector<1x128xi32>
    %c0_i32_3 = arith.constant 0 : i32
    %19 = vector.broadcast %c0_i32_3 : i32 to vector<1x128xi32>
    %20 = arith.cmpi sge, %18, %19 : vector<1x128xi32>
    %c-4_i32_4 = arith.constant -4 : i32
    %21 = vector.broadcast %c-4_i32_4 : i32 to vector<1x128xi32>
    %22 = arith.addi %16, %21 : vector<1x128xi32>
    %c16_i32 = arith.constant 16 : i32
    %23 = vector.broadcast %c16_i32 : i32 to vector<1x128xi32>
    %24 = arith.cmpi slt, %22, %23 : vector<1x128xi32>
    %25 = arith.andi %20, %24 : vector<1x128xi1>
    %c-2_i32 = arith.constant -2 : i32
    %26 = vector.broadcast %c-2_i32 : i32 to vector<1x128xi32>
    %27 = arith.addi %16, %26 : vector<1x128xi32>
    %c0_i32_5 = arith.constant 0 : i32
    %28 = vector.broadcast %c0_i32_5 : i32 to vector<1x128xi32>
    %29 = arith.cmpi sge, %27, %28 : vector<1x128xi32>
    %c-2_i32_6 = arith.constant -2 : i32
    %30 = vector.broadcast %c-2_i32_6 : i32 to vector<1x128xi32>
    %31 = arith.addi %16, %30 : vector<1x128xi32>
    %c16_i32_7 = arith.constant 16 : i32
    %32 = vector.broadcast %c16_i32_7 : i32 to vector<1x128xi32>
    %33 = arith.cmpi slt, %31, %32 : vector<1x128xi32>
    %34 = arith.andi %29, %33 : vector<1x128xi1>
    %c-1_i32 = arith.constant -1 : i32
    %35 = vector.broadcast %c-1_i32 : i32 to vector<1x128xi32>
    %36 = arith.addi %16, %35 : vector<1x128xi32>
    %c0_i32_8 = arith.constant 0 : i32
    %37 = vector.broadcast %c0_i32_8 : i32 to vector<1x128xi32>
    %38 = arith.cmpi sge, %36, %37 : vector<1x128xi32>
    %c-1_i32_9 = arith.constant -1 : i32
    %39 = vector.broadcast %c-1_i32_9 : i32 to vector<1x128xi32>
    %40 = arith.addi %16, %39 : vector<1x128xi32>
    %c16_i32_10 = arith.constant 16 : i32
    %41 = vector.broadcast %c16_i32_10 : i32 to vector<1x128xi32>
    %42 = arith.cmpi slt, %40, %41 : vector<1x128xi32>
    %43 = arith.andi %38, %42 : vector<1x128xi1>
    %c1_i32_11 = arith.constant 1 : i32
    %44 = vector.broadcast %c1_i32_11 : i32 to vector<1x128xi32>
    %45 = arith.addi %16, %44 : vector<1x128xi32>
    %c0_i32_12 = arith.constant 0 : i32
    %46 = vector.broadcast %c0_i32_12 : i32 to vector<1x128xi32>
    %47 = arith.cmpi sge, %45, %46 : vector<1x128xi32>
    %c1_i32_13 = arith.constant 1 : i32
    %48 = vector.broadcast %c1_i32_13 : i32 to vector<1x128xi32>
    %49 = arith.addi %16, %48 : vector<1x128xi32>
    %c16_i32_14 = arith.constant 16 : i32
    %50 = vector.broadcast %c16_i32_14 : i32 to vector<1x128xi32>
    %51 = arith.cmpi slt, %49, %50 : vector<1x128xi32>
    %52 = arith.andi %47, %51 : vector<1x128xi1>
    %c2_i32 = arith.constant 2 : i32
    %53 = vector.broadcast %c2_i32 : i32 to vector<1x128xi32>
    %54 = arith.addi %16, %53 : vector<1x128xi32>
    %c0_i32_15 = arith.constant 0 : i32
    %55 = vector.broadcast %c0_i32_15 : i32 to vector<1x128xi32>
    %56 = arith.cmpi sge, %54, %55 : vector<1x128xi32>
    %c2_i32_16 = arith.constant 2 : i32
    %57 = vector.broadcast %c2_i32_16 : i32 to vector<1x128xi32>
    %58 = arith.addi %16, %57 : vector<1x128xi32>
    %c16_i32_17 = arith.constant 16 : i32
    %59 = vector.broadcast %c16_i32_17 : i32 to vector<1x128xi32>
    %60 = arith.cmpi slt, %58, %59 : vector<1x128xi32>
    %61 = arith.andi %56, %60 : vector<1x128xi1>
    %c4_i32 = arith.constant 4 : i32
    %62 = vector.broadcast %c4_i32 : i32 to vector<1x128xi32>
    %63 = arith.addi %16, %62 : vector<1x128xi32>
    %c0_i32_18 = arith.constant 0 : i32
    %64 = vector.broadcast %c0_i32_18 : i32 to vector<1x128xi32>
    %65 = arith.cmpi sge, %63, %64 : vector<1x128xi32>
    %c4_i32_19 = arith.constant 4 : i32
    %66 = vector.broadcast %c4_i32_19 : i32 to vector<1x128xi32>
    %67 = arith.addi %16, %66 : vector<1x128xi32>
    %c16_i32_20 = arith.constant 16 : i32
    %68 = vector.broadcast %c16_i32_20 : i32 to vector<1x128xi32>
    %69 = arith.cmpi slt, %67, %68 : vector<1x128xi32>
    %70 = arith.andi %65, %69 : vector<1x128xi1>
    %c0 = arith.constant 0 : index
    %c0_21 = arith.constant 0 : index
    %71 = vector.load %arg1[%c0, %c0_21] : memref<8x128xf32, #tpu.memory_space<vmem>>, vector<8x128xf32>
    %c1_i32_22 = arith.constant 1 : i32
    %72 = tpu.dynamic_rotate %71 by %c1_i32_22 dim 1 : vector<8x128xf32>, i32 -> vector<8x128xf32>
    %c0_i32_23 = arith.constant 0 : i32
    %73 = arith.sitofp %c0_i32_23 : i32 to f32
    %74 = vector.shape_cast %43 : vector<1x128xi1> to vector<1x128xi1>
    %75 = vector.broadcast %74 : vector<1x128xi1> to vector<8x128xi1>
    %76 = vector.broadcast %73 : f32 to vector<8x128xf32>
    %77 = arith.select %75, %72, %76 : vector<8x128xi1>, vector<8x128xf32>
    %c0_24 = arith.constant 0 : index
    %c0_25 = arith.constant 0 : index
    %c0_26 = arith.constant 0 : index
    %78 = vector.load %arg2[%c0_24, %c0_25, %c0_26] : memref<3x8x8xf32, #tpu.memory_space<vmem>>, vector<1x8x8xf32>
    %79 = vector.shape_cast %78 : vector<1x8x8xf32> to vector<8x8xf32>
    %cst = arith.constant dense<0.000000e+00> : vector<8x128xf32>
    %80 = tpu.matmul %79, %77, %cst {dimension_numbers = #tpu.dot_dimension_numbers<[1], [0], [0], [1], [0, 0, 1, 1], [], []>} : vector<8x8xf32>, vector<8x128xf32>, vector<8x128xf32> -> vector<8x128xf32>
    %c1 = arith.constant 1 : index
    %c0_27 = arith.constant 0 : index
    %c0_28 = arith.constant 0 : index
    %81 = vector.load %arg2[%c1, %c0_27, %c0_28] : memref<3x8x8xf32, #tpu.memory_space<vmem>>, vector<1x8x8xf32>
    %82 = vector.shape_cast %81 : vector<1x8x8xf32> to vector<8x8xf32>
    %cst_29 = arith.constant dense<0.000000e+00> : vector<8x128xf32>
    %83 = tpu.matmul %82, %71, %cst_29 {dimension_numbers = #tpu.dot_dimension_numbers<[1], [0], [0], [1], [0, 0, 1, 1], [], []>} : vector<8x8xf32>, vector<8x128xf32>, vector<8x128xf32> -> vector<8x128xf32>
    %84 = arith.addf %80, %83 : vector<8x128xf32>
    %c127_i32 = arith.constant 127 : i32
    %85 = tpu.dynamic_rotate %71 by %c127_i32 dim 1 : vector<8x128xf32>, i32 -> vector<8x128xf32>
    %c0_i32_30 = arith.constant 0 : i32
    %86 = arith.sitofp %c0_i32_30 : i32 to f32
    %87 = vector.shape_cast %52 : vector<1x128xi1> to vector<1x128xi1>
    %88 = vector.broadcast %87 : vector<1x128xi1> to vector<8x128xi1>
    %89 = vector.broadcast %86 : f32 to vector<8x128xf32>
    %90 = arith.select %88, %85, %89 : vector<8x128xi1>, vector<8x128xf32>
    %c2 = arith.constant 2 : index
    %c0_31 = arith.constant 0 : index
    %c0_32 = arith.constant 0 : index
    %91 = vector.load %arg2[%c2, %c0_31, %c0_32] : memref<3x8x8xf32, #tpu.memory_space<vmem>>, vector<1x8x8xf32>
    %92 = vector.shape_cast %91 : vector<1x8x8xf32> to vector<8x8xf32>
    %cst_33 = arith.constant dense<0.000000e+00> : vector<8x128xf32>
    %93 = tpu.matmul %92, %90, %cst_33 {dimension_numbers = #tpu.dot_dimension_numbers<[1], [0], [0], [1], [0, 0, 1, 1], [], []>} : vector<8x8xf32>, vector<8x128xf32>, vector<8x128xf32> -> vector<8x128xf32>
    %94 = arith.addf %84, %93 : vector<8x128xf32>
    %c0_34 = arith.constant 0 : index
    %c0_35 = arith.constant 0 : index
    %95 = vector.load %arg3[%c0_34, %c0_35] : memref<8x1xf32, #tpu.memory_space<vmem>>, vector<8x1xf32>
    %96 = vector.broadcast %95 : vector<8x1xf32> to vector<8x128xf32>
    %97 = arith.addf %94, %96 : vector<8x128xf32>
    %cst_36 = arith.constant 0.000000e+00 : f32
    %98 = vector.broadcast %cst_36 : f32 to vector<8x128xf32>
    %99 = arith.maximumf %97, %98 : vector<8x128xf32>
    %c1_i32_37 = arith.constant 1 : i32
    %100 = tpu.dynamic_rotate %99 by %c1_i32_37 dim 1 : vector<8x128xf32>, i32 -> vector<8x128xf32>
    %c0_i32_38 = arith.constant 0 : i32
    %101 = arith.sitofp %c0_i32_38 : i32 to f32
    %102 = vector.shape_cast %43 : vector<1x128xi1> to vector<1x128xi1>
    %103 = vector.broadcast %102 : vector<1x128xi1> to vector<8x128xi1>
    %104 = vector.broadcast %101 : f32 to vector<8x128xf32>
    %105 = arith.select %103, %100, %104 : vector<8x128xi1>, vector<8x128xf32>
    %c0_39 = arith.constant 0 : index
    %c0_40 = arith.constant 0 : index
    %c0_41 = arith.constant 0 : index
    %106 = vector.load %arg4[%c0_39, %c0_40, %c0_41] : memref<3x8x8xf32, #tpu.memory_space<vmem>>, vector<1x8x8xf32>
    %107 = vector.shape_cast %106 : vector<1x8x8xf32> to vector<8x8xf32>
    %cst_42 = arith.constant dense<0.000000e+00> : vector<8x128xf32>
    %108 = tpu.matmul %107, %105, %cst_42 {dimension_numbers = #tpu.dot_dimension_numbers<[1], [0], [0], [1], [0, 0, 1, 1], [], []>} : vector<8x8xf32>, vector<8x128xf32>, vector<8x128xf32> -> vector<8x128xf32>
    %c1_43 = arith.constant 1 : index
    %c0_44 = arith.constant 0 : index
    %c0_45 = arith.constant 0 : index
    %109 = vector.load %arg4[%c1_43, %c0_44, %c0_45] : memref<3x8x8xf32, #tpu.memory_space<vmem>>, vector<1x8x8xf32>
    %110 = vector.shape_cast %109 : vector<1x8x8xf32> to vector<8x8xf32>
    %cst_46 = arith.constant dense<0.000000e+00> : vector<8x128xf32>
    %111 = tpu.matmul %110, %99, %cst_46 {dimension_numbers = #tpu.dot_dimension_numbers<[1], [0], [0], [1], [0, 0, 1, 1], [], []>} : vector<8x8xf32>, vector<8x128xf32>, vector<8x128xf32> -> vector<8x128xf32>
    %112 = arith.addf %108, %111 : vector<8x128xf32>
    %c127_i32_47 = arith.constant 127 : i32
    %113 = tpu.dynamic_rotate %99 by %c127_i32_47 dim 1 : vector<8x128xf32>, i32 -> vector<8x128xf32>
    %c0_i32_48 = arith.constant 0 : i32
    %114 = arith.sitofp %c0_i32_48 : i32 to f32
    %115 = vector.shape_cast %52 : vector<1x128xi1> to vector<1x128xi1>
    %116 = vector.broadcast %115 : vector<1x128xi1> to vector<8x128xi1>
    %117 = vector.broadcast %114 : f32 to vector<8x128xf32>
    %118 = arith.select %116, %113, %117 : vector<8x128xi1>, vector<8x128xf32>
    %c2_49 = arith.constant 2 : index
    %c0_50 = arith.constant 0 : index
    %c0_51 = arith.constant 0 : index
    %119 = vector.load %arg4[%c2_49, %c0_50, %c0_51] : memref<3x8x8xf32, #tpu.memory_space<vmem>>, vector<1x8x8xf32>
    %120 = vector.shape_cast %119 : vector<1x8x8xf32> to vector<8x8xf32>
    %cst_52 = arith.constant dense<0.000000e+00> : vector<8x128xf32>
    %121 = tpu.matmul %120, %118, %cst_52 {dimension_numbers = #tpu.dot_dimension_numbers<[1], [0], [0], [1], [0, 0, 1, 1], [], []>} : vector<8x8xf32>, vector<8x128xf32>, vector<8x128xf32> -> vector<8x128xf32>
    %122 = arith.addf %112, %121 : vector<8x128xf32>
    %c0_53 = arith.constant 0 : index
    %c0_54 = arith.constant 0 : index
    %123 = vector.load %arg5[%c0_53, %c0_54] : memref<8x1xf32, #tpu.memory_space<vmem>>, vector<8x1xf32>
    %124 = vector.broadcast %123 : vector<8x1xf32> to vector<8x128xf32>
    %125 = arith.addf %122, %124 : vector<8x128xf32>
    %c0_55 = arith.constant 0 : index
    %c0_56 = arith.constant 0 : index
    %126 = vector.load %arg6[%c0_55, %c0_56] : memref<8x8xf32, #tpu.memory_space<vmem>>, vector<8x8xf32>
    %cst_57 = arith.constant dense<0.000000e+00> : vector<8x128xf32>
    %127 = tpu.matmul %126, %71, %cst_57 {dimension_numbers = #tpu.dot_dimension_numbers<[1], [0], [0], [1], [0, 0, 1, 1], [], []>} : vector<8x8xf32>, vector<8x128xf32>, vector<8x128xf32> -> vector<8x128xf32>
    %c0_58 = arith.constant 0 : index
    %c0_59 = arith.constant 0 : index
    %128 = vector.load %arg7[%c0_58, %c0_59] : memref<8x1xf32, #tpu.memory_space<vmem>>, vector<8x1xf32>
    %129 = vector.broadcast %128 : vector<8x1xf32> to vector<8x128xf32>
    %130 = arith.addf %127, %129 : vector<8x128xf32>
    %131 = arith.addf %125, %130 : vector<8x128xf32>
    %cst_60 = arith.constant 0.000000e+00 : f32
    %132 = vector.broadcast %cst_60 : f32 to vector<8x128xf32>
    %133 = arith.maximumf %131, %132 : vector<8x128xf32>
    %c2_i32_61 = arith.constant 2 : i32
    %134 = tpu.dynamic_rotate %133 by %c2_i32_61 dim 1 : vector<8x128xf32>, i32 -> vector<8x128xf32>
    %c0_i32_62 = arith.constant 0 : i32
    %135 = arith.sitofp %c0_i32_62 : i32 to f32
    %136 = vector.shape_cast %34 : vector<1x128xi1> to vector<1x128xi1>
    %137 = vector.broadcast %136 : vector<1x128xi1> to vector<8x128xi1>
    %138 = vector.broadcast %135 : f32 to vector<8x128xf32>
    %139 = arith.select %137, %134, %138 : vector<8x128xi1>, vector<8x128xf32>
    %c0_63 = arith.constant 0 : index
    %c0_64 = arith.constant 0 : index
    %c0_65 = arith.constant 0 : index
    %140 = vector.load %arg8[%c0_63, %c0_64, %c0_65] : memref<3x8x8xf32, #tpu.memory_space<vmem>>, vector<1x8x8xf32>
    %141 = vector.shape_cast %140 : vector<1x8x8xf32> to vector<8x8xf32>
    %cst_66 = arith.constant dense<0.000000e+00> : vector<8x128xf32>
    %142 = tpu.matmul %141, %139, %cst_66 {dimension_numbers = #tpu.dot_dimension_numbers<[1], [0], [0], [1], [0, 0, 1, 1], [], []>} : vector<8x8xf32>, vector<8x128xf32>, vector<8x128xf32> -> vector<8x128xf32>
    %c1_67 = arith.constant 1 : index
    %c0_68 = arith.constant 0 : index
    %c0_69 = arith.constant 0 : index
    %143 = vector.load %arg8[%c1_67, %c0_68, %c0_69] : memref<3x8x8xf32, #tpu.memory_space<vmem>>, vector<1x8x8xf32>
    %144 = vector.shape_cast %143 : vector<1x8x8xf32> to vector<8x8xf32>
    %cst_70 = arith.constant dense<0.000000e+00> : vector<8x128xf32>
    %145 = tpu.matmul %144, %133, %cst_70 {dimension_numbers = #tpu.dot_dimension_numbers<[1], [0], [0], [1], [0, 0, 1, 1], [], []>} : vector<8x8xf32>, vector<8x128xf32>, vector<8x128xf32> -> vector<8x128xf32>
    %146 = arith.addf %142, %145 : vector<8x128xf32>
    %c126_i32 = arith.constant 126 : i32
    %147 = tpu.dynamic_rotate %133 by %c126_i32 dim 1 : vector<8x128xf32>, i32 -> vector<8x128xf32>
    %c0_i32_71 = arith.constant 0 : i32
    %148 = arith.sitofp %c0_i32_71 : i32 to f32
    %149 = vector.shape_cast %61 : vector<1x128xi1> to vector<1x128xi1>
    %150 = vector.broadcast %149 : vector<1x128xi1> to vector<8x128xi1>
    %151 = vector.broadcast %148 : f32 to vector<8x128xf32>
    %152 = arith.select %150, %147, %151 : vector<8x128xi1>, vector<8x128xf32>
    %c2_72 = arith.constant 2 : index
    %c0_73 = arith.constant 0 : index
    %c0_74 = arith.constant 0 : index
    %153 = vector.load %arg8[%c2_72, %c0_73, %c0_74] : memref<3x8x8xf32, #tpu.memory_space<vmem>>, vector<1x8x8xf32>
    %154 = vector.shape_cast %153 : vector<1x8x8xf32> to vector<8x8xf32>
    %cst_75 = arith.constant dense<0.000000e+00> : vector<8x128xf32>
    %155 = tpu.matmul %154, %152, %cst_75 {dimension_numbers = #tpu.dot_dimension_numbers<[1], [0], [0], [1], [0, 0, 1, 1], [], []>} : vector<8x8xf32>, vector<8x128xf32>, vector<8x128xf32> -> vector<8x128xf32>
    %156 = arith.addf %146, %155 : vector<8x128xf32>
    %c0_76 = arith.constant 0 : index
    %c0_77 = arith.constant 0 : index
    %157 = vector.load %arg9[%c0_76, %c0_77] : memref<8x1xf32, #tpu.memory_space<vmem>>, vector<8x1xf32>
    %158 = vector.broadcast %157 : vector<8x1xf32> to vector<8x128xf32>
    %159 = arith.addf %156, %158 : vector<8x128xf32>
    %cst_78 = arith.constant 0.000000e+00 : f32
    %160 = vector.broadcast %cst_78 : f32 to vector<8x128xf32>
    %161 = arith.maximumf %159, %160 : vector<8x128xf32>
    %c2_i32_79 = arith.constant 2 : i32
    %162 = tpu.dynamic_rotate %161 by %c2_i32_79 dim 1 : vector<8x128xf32>, i32 -> vector<8x128xf32>
    %c0_i32_80 = arith.constant 0 : i32
    %163 = arith.sitofp %c0_i32_80 : i32 to f32
    %164 = vector.shape_cast %34 : vector<1x128xi1> to vector<1x128xi1>
    %165 = vector.broadcast %164 : vector<1x128xi1> to vector<8x128xi1>
    %166 = vector.broadcast %163 : f32 to vector<8x128xf32>
    %167 = arith.select %165, %162, %166 : vector<8x128xi1>, vector<8x128xf32>
    %c0_81 = arith.constant 0 : index
    %c0_82 = arith.constant 0 : index
    %c0_83 = arith.constant 0 : index
    %168 = vector.load %arg10[%c0_81, %c0_82, %c0_83] : memref<3x8x8xf32, #tpu.memory_space<vmem>>, vector<1x8x8xf32>
    %169 = vector.shape_cast %168 : vector<1x8x8xf32> to vector<8x8xf32>
    %cst_84 = arith.constant dense<0.000000e+00> : vector<8x128xf32>
    %170 = tpu.matmul %169, %167, %cst_84 {dimension_numbers = #tpu.dot_dimension_numbers<[1], [0], [0], [1], [0, 0, 1, 1], [], []>} : vector<8x8xf32>, vector<8x128xf32>, vector<8x128xf32> -> vector<8x128xf32>
    %c1_85 = arith.constant 1 : index
    %c0_86 = arith.constant 0 : index
    %c0_87 = arith.constant 0 : index
    %171 = vector.load %arg10[%c1_85, %c0_86, %c0_87] : memref<3x8x8xf32, #tpu.memory_space<vmem>>, vector<1x8x8xf32>
    %172 = vector.shape_cast %171 : vector<1x8x8xf32> to vector<8x8xf32>
    %cst_88 = arith.constant dense<0.000000e+00> : vector<8x128xf32>
    %173 = tpu.matmul %172, %161, %cst_88 {dimension_numbers = #tpu.dot_dimension_numbers<[1], [0], [0], [1], [0, 0, 1, 1], [], []>} : vector<8x8xf32>, vector<8x128xf32>, vector<8x128xf32> -> vector<8x128xf32>
    %174 = arith.addf %170, %173 : vector<8x128xf32>
    %c126_i32_89 = arith.constant 126 : i32
    %175 = tpu.dynamic_rotate %161 by %c126_i32_89 dim 1 : vector<8x128xf32>, i32 -> vector<8x128xf32>
    %c0_i32_90 = arith.constant 0 : i32
    %176 = arith.sitofp %c0_i32_90 : i32 to f32
    %177 = vector.shape_cast %61 : vector<1x128xi1> to vector<1x128xi1>
    %178 = vector.broadcast %177 : vector<1x128xi1> to vector<8x128xi1>
    %179 = vector.broadcast %176 : f32 to vector<8x128xf32>
    %180 = arith.select %178, %175, %179 : vector<8x128xi1>, vector<8x128xf32>
    %c2_91 = arith.constant 2 : index
    %c0_92 = arith.constant 0 : index
    %c0_93 = arith.constant 0 : index
    %181 = vector.load %arg10[%c2_91, %c0_92, %c0_93] : memref<3x8x8xf32, #tpu.memory_space<vmem>>, vector<1x8x8xf32>
    %182 = vector.shape_cast %181 : vector<1x8x8xf32> to vector<8x8xf32>
    %cst_94 = arith.constant dense<0.000000e+00> : vector<8x128xf32>
    %183 = tpu.matmul %182, %180, %cst_94 {dimension_numbers = #tpu.dot_dimension_numbers<[1], [0], [0], [1], [0, 0, 1, 1], [], []>} : vector<8x8xf32>, vector<8x128xf32>, vector<8x128xf32> -> vector<8x128xf32>
    %184 = arith.addf %174, %183 : vector<8x128xf32>
    %c0_95 = arith.constant 0 : index
    %c0_96 = arith.constant 0 : index
    %185 = vector.load %arg11[%c0_95, %c0_96] : memref<8x1xf32, #tpu.memory_space<vmem>>, vector<8x1xf32>
    %186 = vector.broadcast %185 : vector<8x1xf32> to vector<8x128xf32>
    %187 = arith.addf %184, %186 : vector<8x128xf32>
    %188 = arith.addf %187, %133 : vector<8x128xf32>
    %cst_97 = arith.constant 0.000000e+00 : f32
    %189 = vector.broadcast %cst_97 : f32 to vector<8x128xf32>
    %190 = arith.maximumf %188, %189 : vector<8x128xf32>
    %c4_i32_98 = arith.constant 4 : i32
    %191 = tpu.dynamic_rotate %190 by %c4_i32_98 dim 1 : vector<8x128xf32>, i32 -> vector<8x128xf32>
    %c0_i32_99 = arith.constant 0 : i32
    %192 = arith.sitofp %c0_i32_99 : i32 to f32
    %193 = vector.shape_cast %25 : vector<1x128xi1> to vector<1x128xi1>
    %194 = vector.broadcast %193 : vector<1x128xi1> to vector<8x128xi1>
    %195 = vector.broadcast %192 : f32 to vector<8x128xf32>
    %196 = arith.select %194, %191, %195 : vector<8x128xi1>, vector<8x128xf32>
    %c0_100 = arith.constant 0 : index
    %c0_101 = arith.constant 0 : index
    %c0_102 = arith.constant 0 : index
    %197 = vector.load %arg12[%c0_100, %c0_101, %c0_102] : memref<3x8x8xf32, #tpu.memory_space<vmem>>, vector<1x8x8xf32>
    %198 = vector.shape_cast %197 : vector<1x8x8xf32> to vector<8x8xf32>
    %cst_103 = arith.constant dense<0.000000e+00> : vector<8x128xf32>
    %199 = tpu.matmul %198, %196, %cst_103 {dimension_numbers = #tpu.dot_dimension_numbers<[1], [0], [0], [1], [0, 0, 1, 1], [], []>} : vector<8x8xf32>, vector<8x128xf32>, vector<8x128xf32> -> vector<8x128xf32>
    %c1_104 = arith.constant 1 : index
    %c0_105 = arith.constant 0 : index
    %c0_106 = arith.constant 0 : index
    %200 = vector.load %arg12[%c1_104, %c0_105, %c0_106] : memref<3x8x8xf32, #tpu.memory_space<vmem>>, vector<1x8x8xf32>
    %201 = vector.shape_cast %200 : vector<1x8x8xf32> to vector<8x8xf32>
    %cst_107 = arith.constant dense<0.000000e+00> : vector<8x128xf32>
    %202 = tpu.matmul %201, %190, %cst_107 {dimension_numbers = #tpu.dot_dimension_numbers<[1], [0], [0], [1], [0, 0, 1, 1], [], []>} : vector<8x8xf32>, vector<8x128xf32>, vector<8x128xf32> -> vector<8x128xf32>
    %203 = arith.addf %199, %202 : vector<8x128xf32>
    %c124_i32 = arith.constant 124 : i32
    %204 = tpu.dynamic_rotate %190 by %c124_i32 dim 1 : vector<8x128xf32>, i32 -> vector<8x128xf32>
    %c0_i32_108 = arith.constant 0 : i32
    %205 = arith.sitofp %c0_i32_108 : i32 to f32
    %206 = vector.shape_cast %70 : vector<1x128xi1> to vector<1x128xi1>
    %207 = vector.broadcast %206 : vector<1x128xi1> to vector<8x128xi1>
    %208 = vector.broadcast %205 : f32 to vector<8x128xf32>
    %209 = arith.select %207, %204, %208 : vector<8x128xi1>, vector<8x128xf32>
    %c2_109 = arith.constant 2 : index
    %c0_110 = arith.constant 0 : index
    %c0_111 = arith.constant 0 : index
    %210 = vector.load %arg12[%c2_109, %c0_110, %c0_111] : memref<3x8x8xf32, #tpu.memory_space<vmem>>, vector<1x8x8xf32>
    %211 = vector.shape_cast %210 : vector<1x8x8xf32> to vector<8x8xf32>
    %cst_112 = arith.constant dense<0.000000e+00> : vector<8x128xf32>
    %212 = tpu.matmul %211, %209, %cst_112 {dimension_numbers = #tpu.dot_dimension_numbers<[1], [0], [0], [1], [0, 0, 1, 1], [], []>} : vector<8x8xf32>, vector<8x128xf32>, vector<8x128xf32> -> vector<8x128xf32>
    %213 = arith.addf %203, %212 : vector<8x128xf32>
    %c0_113 = arith.constant 0 : index
    %c0_114 = arith.constant 0 : index
    %214 = vector.load %arg13[%c0_113, %c0_114] : memref<8x1xf32, #tpu.memory_space<vmem>>, vector<8x1xf32>
    %215 = vector.broadcast %214 : vector<8x1xf32> to vector<8x128xf32>
    %216 = arith.addf %213, %215 : vector<8x128xf32>
    %cst_115 = arith.constant 0.000000e+00 : f32
    %217 = vector.broadcast %cst_115 : f32 to vector<8x128xf32>
    %218 = arith.maximumf %216, %217 : vector<8x128xf32>
    %c4_i32_116 = arith.constant 4 : i32
    %219 = tpu.dynamic_rotate %218 by %c4_i32_116 dim 1 : vector<8x128xf32>, i32 -> vector<8x128xf32>
    %c0_i32_117 = arith.constant 0 : i32
    %220 = arith.sitofp %c0_i32_117 : i32 to f32
    %221 = vector.shape_cast %25 : vector<1x128xi1> to vector<1x128xi1>
    %222 = vector.broadcast %221 : vector<1x128xi1> to vector<8x128xi1>
    %223 = vector.broadcast %220 : f32 to vector<8x128xf32>
    %224 = arith.select %222, %219, %223 : vector<8x128xi1>, vector<8x128xf32>
    %c0_118 = arith.constant 0 : index
    %c0_119 = arith.constant 0 : index
    %c0_120 = arith.constant 0 : index
    %225 = vector.load %arg14[%c0_118, %c0_119, %c0_120] : memref<3x8x8xf32, #tpu.memory_space<vmem>>, vector<1x8x8xf32>
    %226 = vector.shape_cast %225 : vector<1x8x8xf32> to vector<8x8xf32>
    %cst_121 = arith.constant dense<0.000000e+00> : vector<8x128xf32>
    %227 = tpu.matmul %226, %224, %cst_121 {dimension_numbers = #tpu.dot_dimension_numbers<[1], [0], [0], [1], [0, 0, 1, 1], [], []>} : vector<8x8xf32>, vector<8x128xf32>, vector<8x128xf32> -> vector<8x128xf32>
    %c1_122 = arith.constant 1 : index
    %c0_123 = arith.constant 0 : index
    %c0_124 = arith.constant 0 : index
    %228 = vector.load %arg14[%c1_122, %c0_123, %c0_124] : memref<3x8x8xf32, #tpu.memory_space<vmem>>, vector<1x8x8xf32>
    %229 = vector.shape_cast %228 : vector<1x8x8xf32> to vector<8x8xf32>
    %cst_125 = arith.constant dense<0.000000e+00> : vector<8x128xf32>
    %230 = tpu.matmul %229, %218, %cst_125 {dimension_numbers = #tpu.dot_dimension_numbers<[1], [0], [0], [1], [0, 0, 1, 1], [], []>} : vector<8x8xf32>, vector<8x128xf32>, vector<8x128xf32> -> vector<8x128xf32>
    %231 = arith.addf %227, %230 : vector<8x128xf32>
    %c124_i32_126 = arith.constant 124 : i32
    %232 = tpu.dynamic_rotate %218 by %c124_i32_126 dim 1 : vector<8x128xf32>, i32 -> vector<8x128xf32>
    %c0_i32_127 = arith.constant 0 : i32
    %233 = arith.sitofp %c0_i32_127 : i32 to f32
    %234 = vector.shape_cast %70 : vector<1x128xi1> to vector<1x128xi1>
    %235 = vector.broadcast %234 : vector<1x128xi1> to vector<8x128xi1>
    %236 = vector.broadcast %233 : f32 to vector<8x128xf32>
    %237 = arith.select %235, %232, %236 : vector<8x128xi1>, vector<8x128xf32>
    %c2_128 = arith.constant 2 : index
    %c0_129 = arith.constant 0 : index
    %c0_130 = arith.constant 0 : index
    %238 = vector.load %arg14[%c2_128, %c0_129, %c0_130] : memref<3x8x8xf32, #tpu.memory_space<vmem>>, vector<1x8x8xf32>
    %239 = vector.shape_cast %238 : vector<1x8x8xf32> to vector<8x8xf32>
    %cst_131 = arith.constant dense<0.000000e+00> : vector<8x128xf32>
    %240 = tpu.matmul %239, %237, %cst_131 {dimension_numbers = #tpu.dot_dimension_numbers<[1], [0], [0], [1], [0, 0, 1, 1], [], []>} : vector<8x8xf32>, vector<8x128xf32>, vector<8x128xf32> -> vector<8x128xf32>
    %241 = arith.addf %231, %240 : vector<8x128xf32>
    %c0_132 = arith.constant 0 : index
    %c0_133 = arith.constant 0 : index
    %242 = vector.load %arg15[%c0_132, %c0_133] : memref<8x1xf32, #tpu.memory_space<vmem>>, vector<8x1xf32>
    %243 = vector.broadcast %242 : vector<8x1xf32> to vector<8x128xf32>
    %244 = arith.addf %241, %243 : vector<8x128xf32>
    %c0_134 = arith.constant 0 : index
    %c0_135 = arith.constant 0 : index
    %245 = vector.load %arg16[%c0_134, %c0_135] : memref<8x8xf32, #tpu.memory_space<vmem>>, vector<8x8xf32>
    %cst_136 = arith.constant dense<0.000000e+00> : vector<8x128xf32>
    %246 = tpu.matmul %245, %190, %cst_136 {dimension_numbers = #tpu.dot_dimension_numbers<[1], [0], [0], [1], [0, 0, 1, 1], [], []>} : vector<8x8xf32>, vector<8x128xf32>, vector<8x128xf32> -> vector<8x128xf32>
    %c0_137 = arith.constant 0 : index
    %c0_138 = arith.constant 0 : index
    %247 = vector.load %arg17[%c0_137, %c0_138] : memref<8x1xf32, #tpu.memory_space<vmem>>, vector<8x1xf32>
    %248 = vector.broadcast %247 : vector<8x1xf32> to vector<8x128xf32>
    %249 = arith.addf %246, %248 : vector<8x128xf32>
    %250 = arith.addf %244, %249 : vector<8x128xf32>
    %cst_139 = arith.constant 0.000000e+00 : f32
    %251 = vector.broadcast %cst_139 : f32 to vector<8x128xf32>
    %252 = arith.maximumf %250, %251 : vector<8x128xf32>
    %c0_140 = arith.constant 0 : index
    %c0_141 = arith.constant 0 : index
    %253 = vector.load %arg18[%c0_140, %c0_141] : memref<8x128xf32, #tpu.memory_space<vmem>>, vector<8x128xf32>
    tpu.vector_store %arg18[%c0_140, %c0_141], %252 {strides = array<i32>} : memref<8x128xf32, #tpu.memory_space<vmem>>, vector<8x128xf32>,
    return
  }
  func.func @transform_0(%arg0: i32) -> (i32, i32) {
    %c0_i32 = arith.constant 0 : i32
    %c0_i32_0 = arith.constant 0 : i32
    return %c0_i32, %arg0 : i32, i32
  }
  func.func @transform_1(%arg0: i32) -> (i32, i32, i32) {
    %c0_i32 = arith.constant 0 : i32
    %c0_i32_0 = arith.constant 0 : i32
    %c0_i32_1 = arith.constant 0 : i32
    %c0_i32_2 = arith.constant 0 : i32
    return %c0_i32, %c0_i32_0, %c0_i32_1 : i32, i32, i32
  }
  func.func @transform_2(%arg0: i32) -> (i32, i32) {
    %c0_i32 = arith.constant 0 : i32
    %c0_i32_0 = arith.constant 0 : i32
    %c0_i32_1 = arith.constant 0 : i32
    return %c0_i32, %c0_i32_0 : i32, i32
  }
  func.func @transform_3(%arg0: i32) -> (i32, i32, i32) {
    %c0_i32 = arith.constant 0 : i32
    %c0_i32_0 = arith.constant 0 : i32
    %c0_i32_1 = arith.constant 0 : i32
    %c0_i32_2 = arith.constant 0 : i32
    return %c0_i32, %c0_i32_0, %c0_i32_1 : i32, i32, i32
  }
  func.func @transform_4(%arg0: i32) -> (i32, i32) {
    %c0_i32 = arith.constant 0 : i32
    %c0_i32_0 = arith.constant 0 : i32
    %c0_i32_1 = arith.constant 0 : i32
    return %c0_i32, %c0_i32_0 : i32, i32
  }
  func.func @transform_5(%arg0: i32) -> (i32, i32) {
    %c0_i32 = arith.constant 0 : i32
    %c0_i32_0 = arith.constant 0 : i32
    %c0_i32_1 = arith.constant 0 : i32
    return %c0_i32, %c0_i32_0 : i32, i32
  }
  func.func @transform_6(%arg0: i32) -> (i32, i32) {
    %c0_i32 = arith.constant 0 : i32
    %c0_i32_0 = arith.constant 0 : i32
    %c0_i32_1 = arith.constant 0 : i32
    return %c0_i32, %c0_i32_0 : i32, i32
  }
  func.func @transform_7(%arg0: i32) -> (i32, i32, i32) {
    %c0_i32 = arith.constant 0 : i32
    %c0_i32_0 = arith.constant 0 : i32
    %c0_i32_1 = arith.constant 0 : i32
    %c0_i32_2 = arith.constant 0 : i32
    return %c0_i32, %c0_i32_0, %c0_i32_1 : i32, i32, i32
  }
  func.func @transform_8(%arg0: i32) -> (i32, i32) {
    %c0_i32 = arith.constant 0 : i32
    %c0_i32_0 = arith.constant 0 : i32
    %c0_i32_1 = arith.constant 0 : i32
    return %c0_i32, %c0_i32_0 : i32, i32
  }
  func.func @transform_9(%arg0: i32) -> (i32, i32, i32) {
    %c0_i32 = arith.constant 0 : i32
    %c0_i32_0 = arith.constant 0 : i32
    %c0_i32_1 = arith.constant 0 : i32
    %c0_i32_2 = arith.constant 0 : i32
    return %c0_i32, %c0_i32_0, %c0_i32_1 : i32, i32, i32
  }
  func.func @transform_10(%arg0: i32) -> (i32, i32) {
    %c0_i32 = arith.constant 0 : i32
    %c0_i32_0 = arith.constant 0 : i32
    %c0_i32_1 = arith.constant 0 : i32
    return %c0_i32, %c0_i32_0 : i32, i32
  }
  func.func @transform_11(%arg0: i32) -> (i32, i32, i32) {
    %c0_i32 = arith.constant 0 : i32
    %c0_i32_0 = arith.constant 0 : i32
    %c0_i32_1 = arith.constant 0 : i32
    %c0_i32_2 = arith.constant 0 : i32
    return %c0_i32, %c0_i32_0, %c0_i32_1 : i32, i32, i32
  }
  func.func @transform_12(%arg0: i32) -> (i32, i32) {
    %c0_i32 = arith.constant 0 : i32
    %c0_i32_0 = arith.constant 0 : i32
    %c0_i32_1 = arith.constant 0 : i32
    return %c0_i32, %c0_i32_0 : i32, i32
  }
  func.func @transform_13(%arg0: i32) -> (i32, i32, i32) {
    %c0_i32 = arith.constant 0 : i32
    %c0_i32_0 = arith.constant 0 : i32
    %c0_i32_1 = arith.constant 0 : i32
    %c0_i32_2 = arith.constant 0 : i32
    return %c0_i32, %c0_i32_0, %c0_i32_1 : i32, i32, i32
  }
  func.func @transform_14(%arg0: i32) -> (i32, i32) {
    %c0_i32 = arith.constant 0 : i32
    %c0_i32_0 = arith.constant 0 : i32
    %c0_i32_1 = arith.constant 0 : i32
    return %c0_i32, %c0_i32_0 : i32, i32
  }
  func.func @transform_15(%arg0: i32) -> (i32, i32) {
    %c0_i32 = arith.constant 0 : i32
    %c0_i32_0 = arith.constant 0 : i32
    %c0_i32_1 = arith.constant 0 : i32
    return %c0_i32, %c0_i32_0 : i32, i32
  }
  func.func @transform_16(%arg0: i32) -> (i32, i32) {
    %c0_i32 = arith.constant 0 : i32
    %c0_i32_0 = arith.constant 0 : i32
    %c0_i32_1 = arith.constant 0 : i32
    return %c0_i32, %c0_i32_0 : i32, i32
  }
  func.func @transform_17(%arg0: i32) -> (i32, i32) {
    %c0_i32 = arith.constant 0 : i32
    %c0_i32_0 = arith.constant 0 : i32
    return %c0_i32, %arg0 : i32, i32
  }
}

</mosaic_0001>

<bundles_post_ra>
// kernel: tpu_custom_call.1
= control target key start
LH: loop header
LB: loop body
LE: loop exit
PB: predicated region body
PF: predicated region fallthrough
CT: control target
= control target key end

     0   :  { %s3341_s0 = inlined_call_operand.hbm [shape: f32[8,256], index: 0, kind: input, shape index: {}]   ;;  %s3342_s1 = inlined_call_operand.vmem [shape: f32[3,8,8], index: 1, kind: input, shape index: {}]   ;;  %s3343_s2 = inlined_call_operand.vmem [shape: f32[8,1], index: 2, kind: input, shape index: {}]   ;;  %s3344_s3 = inlined_call_operand.vmem [shape: f32[3,8,8], index: 3, kind: input, shape index: {}]   ;;  %s3345_s4 = inlined_call_operand.vmem [shape: f32[8,1], index: 4, kind: input, shape index: {}]   ;;  %s3346_s5 = inlined_call_operand.hbm [shape: f32[8,8], index: 5, kind: input, shape index: {}]   ;;  %s3347_s6 = inlined_call_operand.vmem [shape: f32[8,1], index: 6, kind: input, shape index: {}]   ;;  %s3348_s7 = inlined_call_operand.vmem [shape: f32[3,8,8], index: 7, kind: input, shape index: {}]   ;;  %s3349_s8 = inlined_call_operand.vmem [shape: f32[8,1], index: 8, kind: input, shape index: {}]   ;;  %s3350_s9 = inlined_call_operand.vmem [shape: f32[3,8,8], index: 9, kind: input, shape index: {}]   ;;  %s3351_s10 = inlined_call_operand.vmem [shape: f32[8,1], index: 10, kind: input, shape index: {}]   ;;  %s3352_s11 = inlined_call_operand.hbm [shape: f32[3,8,8], index: 11, kind: input, shape index: {}]   ;;  %s3353_s12 = inlined_call_operand.vmem [shape: f32[8,1], index: 12, kind: input, shape index: {}]   ;;  %s3354_s13 = inlined_call_operand.vmem [shape: f32[3,8,8], index: 13, kind: input, shape index: {}]   ;;  %s3355_s14 = inlined_call_operand.vmem [shape: f32[8,1], index: 14, kind: input, shape index: {}]   ;;  %s3356_s15 = inlined_call_operand.vmem [shape: f32[8,8], index: 15, kind: input, shape index: {}]   ;;  %s3357_s16 = inlined_call_operand.vmem [shape: f32[8,1], index: 16, kind: input, shape index: {}]   ;;  %s3358_s17 = inlined_call_operand.hbm [shape: f32[8,256], index: 17, kind: output, shape index: {}]  }
   0x1   :  { %3367 = sst [smem:[#allocation15_spill]] %s3341_s0 }
   0x2   :  { %3368 = sst [smem:[#allocation16_spill]] %s3342_s1 }
   0x3   :  { %3369 = sst [smem:[#allocation17_spill]] %s3346_s5 }
   0x4   :  { %3370 = sst [smem:[#allocation18_spill]] %s3352_s11 }
   0x5   :  { %3371 = sst [smem:[#allocation19_spill]] %s3355_s14 }
   0x6   :  { %3372 = sst [smem:[#allocation20_spill]] %s3356_s15 }
   0x7   :  { %3373 = sst [smem:[#allocation21_spill]] %s3358_s17 }
   0x8   :  { %22 = vsyncpa [#allocation3], 0 }
   0x9   :  { %24 = vsyncpa [#allocation3 + $0x1], 0 }
   0xa   :  { %25 = vsyncpa [#allocation6], 0 }
   0xb   :  { %26 = vsyncpa [#allocation4], 0 }
   0xc   :  { %28 = vsyncpa [#allocation4 + $0x1], 0  ;;  %s2901_s24 = smov 0   ;;  %s2903_s25 = smov 0  }
   0xd   :  { %s2905_s26 = smov 0   ;;  %s2907_s27 = smov 0  }
   0xe LB: > { %3374 = sst [smem:[#allocation12_spill]] %s2782_s24  ;;  %s2922_s28 = sadd.s32 4294967295, %s2794_s27   ;;  %s2794_s27 = sphi %s2907_s27, %s3409_s27   ;;  %s2790_s26 = sphi %s2905_s26, %s3408_s26   ;;  %s2786_s25 = sphi %s2903_s25, %s3407_s25   ;;  %s2782_s24 = sphi %s2901_s24, %s3406_s24  }
   0xf   : > { %s2344_s29 = sadd.s32 4294967294, %s2794_s27   ;;  %p54_p0 = scmp.ne.s32.totalorder %s2786_s25, %s2782_s24 }
  0x10   : > { %p3364_p1 = scmp.eq.s32.totalorder %s2922_s28, 0  ;;  %p420_p3 = scmp.eq.s32.totalorder %s2344_s29, 1 }
  0x11   : > { %p2345_p5 = scmp.ge.s32.totalorder %s2794_s27, 1  ;;  %p427_p7 = scmp.lt.s32.totalorder %s2794_s27, 3 }
  0x12   : > { %p2931_p4 = por %p3364_p1, %p54_p0  ;;  %p2936_p6 = por %p420_p3, %p54_p0 }
  0x13   : > { %p2941_p8 = pnand %p2345_p5, %p427_p7  ;;  %s2796_s19 = smov [#allocation5]  }
  0x14   : > { %s3375_s0 = scalar_select %p2931_p4, 1, 0 }
  0x15   : > { %s3376_s30 = scalar_select %p2936_p6, 1, 0 }
  0x16   : > { %s3378_s18 = scalar_select %p2941_p8, 1, 0 }
  0x17   : > { %3377 = sst [smem:[#allocation13_spill]] %s3376_s30  ;;  %s452_s1 = sshll.u32 %s2796_s19, 4  ;;  %s453_s1 = int_to_ptr.vmem [resolvable:$true] %s452_s1 }
  0x18   : > { %p2570_p10 = pneg %p2941_p8  ;;  %s2797_s20 = smov [#allocation7]  }
  0x19   : > { %s477_s21 = sshll.u32 %s2797_s20, 4  ;;  %s3380_s5 = sld [smem:[#allocation17_spill]]  ;;  %s2954_s21 = int_to_ptr.vmem [resolvable:$true] %s477_s21 }
  0x1a   : > { %p2950_p11 = pnand %p2570_p10, %p3364_p1 }
  0x1c   : > { %p2640_p13 = pneg %p2950_p11 }
  0x1f   : > { %s2638_s30 = scalar_lea.hbm %s3380_s5, 128 }
  0x20   : > { %p2639_p12 = scmp.ne.s32.totalorder %s3380_s5, %s2638_s30  ;;  %p2645_p5 = scmp.lt.u32.totalorder %s2638_s30, %s3380_s5 }
  0x22   : > { %p2641_p0 = pnand %p2640_p13, %p2639_p12 }
  0x24   : > { %p2642_p3 = pneg %p2641_p0 }
  0x26   : > { %p2647_p7 = pnand %p2645_p5, %p2642_p3 }
  0x28   : > { %2650 = shalt.err (!%p2647_p7)
}
  0x29   : > { %s2651_s15 = scalar_lea.vmem %s453_s1, 128  ;;  %p2659_p2 = scmp.lt.s32.totalorder %s453_s1, %s453_s1 }
  0x2a   : > { %p2652_p10 = scmp.ne.s32.totalorder %s453_s1, %s2651_s15  ;;  %p2660_p6 = scmp.lt.s32.totalorder %s2651_s15, %s2651_s15 }
  0x2c   : > { %p2654_p9 = pnand %p2652_p10, %p2640_p13  ;;  %p2661_p4 = por %p2660_p6, %p2659_p2 }
  0x2e   : > { %p2655_p1 = pneg %p2654_p9 }
  0x30   : > { %p2662_p8 = pnand %p2661_p4, %p2655_p1 }
  0x32   : > { %2665 = shalt.err (!%p2662_p8)
}
  0x33   : > { %2573 = dma.hbm_to_vmem [thread:$0]  (!%p2950_p11), %s3380_s5, 128, %s453_s1, [#allocation6]  }
  0x34   : > { %s3381_s11 = sld [smem:[#allocation18_spill]] }
  0x3a   : > { %s2666_s29 = scalar_lea.hbm %s3381_s11, 384 }
  0x3b   : > { %p2667_p9 = scmp.ne.s32.totalorder %s3381_s11, %s2666_s29  ;;  %p2673_p4 = scmp.lt.u32.totalorder %s2666_s29, %s3381_s11 }
  0x3d   : > { %p2669_p2 = pnand %p2667_p9, %p2640_p13 }
  0x3f   : > { %p2670_p1 = pneg %p2669_p2 }
  0x41   : > { %p2675_p6 = pnand %p2673_p4, %p2670_p1 }
  0x43   : > { %2678 = shalt.err (!%p2675_p6)
}
  0x44   : > { %s2679_s1 = scalar_lea.vmem %s2954_s21, 384  ;;  %p2687_p3 = scmp.lt.s32.totalorder %s2954_s21, %s2954_s21 }
  0x45   : > { %p2680_p8 = scmp.ne.s32.totalorder %s2954_s21, %s2679_s1  ;;  %p2688_p5 = scmp.lt.s32.totalorder %s2679_s1, %s2679_s1 }
  0x47   : > { %p2682_p12 = pnand %p2680_p8, %p2640_p13  ;;  %p2689_p7 = por %p2688_p5, %p2687_p3 }
  0x49   : > { %p2683_p0 = pneg %p2682_p12 }
  0x4b   : > { %p2690_p10 = pnand %p2689_p7, %p2683_p0 }
  0x4d   : > { %2693 = shalt.err (!%p2690_p10)
}
  0x4e   : > { %s2798_s14 = smov 128   ;;  %s2799_s24 = smov 8  }
  0x4f   : > { %2576 = dma.hbm_to_vmem [thread:$0]  (!%p2950_p11), %s3381_s11, 384, %s2954_s21, [#allocation6], %s2798_s14, %s2798_s14, %s2799_s24  }
  0x50   : > { %s3004_s30 = sadd.s32 1, %s2794_s27   ;;  %s41_s29 = sadd.s32 1, %s2790_s26 }
  0x51   : > { %s38_s19 = ssub.s32 %s2794_s27, %s3004_s30  ;;  %p48_p13 = scmp.ne.s32.totalorder %s2790_s26, %s2786_s25 }
  0x52   : > { %p39_p9 = scmp.eq.s32.totalorder %s38_s19, 0  ;;  %p49_p2 = scmp.eq.s32.totalorder %s2794_s27, 0 }
  0x53   : > { %p3382_p1 = scmp.eq.s32.totalorder %s2922_s28, 1  ;;  %p2587_p6 = scmp.lt.s32.totalorder %s2794_s27, 2 }
  0x54   : > { %s3020_s15 = scalar_select %p39_p9, %s2790_s26, %s41_s29  }
  0x55   : > { %p3014_p4 = por %p3382_p1, %p48_p13  ;;  %p50_p8 = por %p49_p2, %p48_p13 }
  0x56   : > { %3384 = sst [smem:[#allocation14_spill]] %s3020_s15  ;;  %s506_s22 = sand.u32 1, %s2790_s26  }
  0x57   : > { %s2349_s1 = sshll.u32 %s506_s22, 3  ;;  %s2350_s21 = sshll.u32 %s2794_s27, 7 }
  0x58   : > { %s3385_s23 = sld [smem:[#allocation15_spill]]  ;;  %s510_s19 = scalar_lea.vmem [#allocation2], %s2349_s1 }
  0x59   : > { %s517_s5 = sshll.u32 %s510_s19, 4  ;;  %p3031_p11 = pnand %p2587_p6, %p50_p8  ;;  %s3029_s5 = int_to_ptr.vmem [resolvable:$true] %s517_s5 }
  0x5a   : > { %s507_s11 = scalar_lea.sflag [#allocation3], %s506_s22 }
  0x5b   : > { %p2696_p0 = pneg %p3031_p11 }
  0x5e   : > { %s3027_s17 = scalar_lea.hbm %s3385_s23, %s2350_s21  ;;  %s2699_s14 = scalar_lea.hbm %s3385_s23, 256 }
  0x5f   : > { %s2694_s15 = scalar_lea.hbm %s3027_s17, 128  ;;  %p2700_p7 = scmp.lt.u32.totalorder %s3027_s17, %s3385_s23 }
  0x60   : > { %p2695_p12 = scmp.ne.s32.totalorder %s3027_s17, %s2694_s15  ;;  %p2701_p10 = scmp.lt.u32.totalorder %s2699_s14, %s2694_s15 }
  0x61   : > { %p2703_p9 = scmp.lt.u32.totalorder %s2694_s15, %s3027_s17 }
  0x62   : > { %p2697_p3 = pnand %p2696_p0, %p2695_p12  ;;  %p2702_p13 = por %p2701_p10, %p2700_p7 }
  0x64   : > { %p2698_p5 = pneg %p2697_p3  ;;  %p2704_p2 = por %p2703_p9, %p2702_p13 }
  0x66   : > { %p2705_p1 = pnand %p2704_p2, %p2698_p5 }
  0x68   : > { %2708 = shalt.err (!%p2705_p1)
}
  0x69   : > { %s2709_s22 = scalar_lea.vmem %s3029_s5, 128  ;;  %s2800_s21 = smov [#allocation2]  }
  0x6a   : > { %p2710_p6 = scmp.ne.s32.totalorder %s3029_s5, %s2709_s22  ;;  %s2714_s1 = sshll.u32 %s2800_s21, 4  ;;  %s2715_s1 = int_to_ptr.vmem [resolvable:$false] %s2714_s1 }
  0x6b   : > { %s2716_s24 = scalar_lea.vmem %s2715_s1, 256  ;;  %p2717_p3 = scmp.lt.s32.totalorder %s3029_s5, %s2715_s1 }
  0x6c   : > { %p2712_p8 = pnand %p2710_p6, %p2696_p0  ;;  %p2718_p7 = scmp.lt.s32.totalorder %s2716_s24, %s2709_s22 }
  0x6e   : > { %p2713_p12 = pneg %p2712_p8  ;;  %p2719_p10 = por %p2718_p7, %p2717_p3 }
  0x70   : > { %p2720_p13 = pnand %p2719_p10, %p2713_p12 }
  0x72   : > { %2723 = shalt.err (!%p2720_p13)
}
  0x73   : > { %2580 = dma.hbm_to_vmem [thread:$0]  (!%p3031_p11), %s3027_s17, 128, %s3029_s5, %s507_s11  }
  0x74   : > { %p3387_p5 = scmp.ne.s32.totalorder %s3378_s18, 0 }
  0x75   : > { %s3063_s15 = sand.u32 (!%p3387_p5), 1, %s2786_s25   ;;  %p3388_p0 = scmp.ne.s32.totalorder (!%p3387_p5), %s3375_s0, 0 }
  0x76   : > { %526 = sbr.rel (%p3387_p5) target bundleno = 2193 (0x891), region = 88  ;;  %s2352_s14 = sshll.u32 (!%p3387_p5), %s3063_s15, 3 }
  0x77   : > { %s529_s19 = scalar_lea.sflag (!%p3387_p5), [#allocation3], %s3063_s15  ;;  %s532_s22 = scalar_lea.vmem (!%p3387_p5), [#allocation2], %s2352_s14 }
  0x7d   : > { %2769 = dma.done.wait (%p3388_p0), %s529_s19, 128  }
  0x7e   : > { %2771 = vsyncadd (%p3388_p0), %s529_s19, 4294967168  ;;  %p3389_p11 = scmp.eq.s32.totalorder %s2922_s28, 0 }
  0x80   : > { %2773 = dma.done.wait (%p3389_p11), [#allocation6], 512   ;;  %p3390_p9 = pmov %p3389_p11 }
  0x81   : > { %v2801_v0 = vmov 0.0   ;;  %vm2802_vm0 = vmmov 0   ;;  %v2803_v1 = vmov 0   ;;  %vm638_vm1 = vcmask 64512   ;;  %v3083_v2 = vld [vmem:[%s532_s22] sm:$0xff]  ;;  %s3391_s0 = sld [smem:[#allocation16_spill]] }
  0x82   : > { %2775 = vsyncadd (%p3390_p9), [#allocation6], 4294966784  ;;  %2442 = vmatprep.subr.mxu1 %v2801_v0  ;;  %2444 = vmatprep.mubr.msk.f32.mxu1 %vm2802_vm0, %v2801_v0  ;;  %s2804_s18 = smov 1   ;;  %v866_v4 = vld [vmem:[%s3343_s2] sm:$0xff]  ;;  %s2805_s21 = smov 127   ;;  %v591_v5 = vlaneseq  ;;  %v2363_v25 = vld [vmem:[%s3344_s3 + $0x8] sm:$0xff] }
  0x83   : > { %2636 = vset.pattern.permute.xlu1 %v2803_v1  ;;  %2637 = vset.pattern.permute.xlu0 %v2803_v1  ;;  %v1113_v26 = vld [vmem:[%s3347_s6] sm:$0xff]  ;;  %v2367_v32 = vld [vmem:[%s3344_s3 + $0x10] sm:$0xff]  ;;  %v2371_v41 = vld [vmem:[%s3348_s7 + $0x8] sm:$0xff]  ;;  %s2806_s1 = smov 2   ;;  %s2807_s24 = smov 126  }
  0x84   : > { %2477 = vmatprep.subr.mxu0 %v2801_v0  ;;  %2479 = vmatprep.mubr.msk.f32.mxu0 %vm2802_vm0, %v2801_v0  ;;  %v3100_v6 = vand.u32 127, %v591_v5  ;;  %v1105_v27 = vld [vmem:[%s3345_s4] sm:$0xff]  ;;  %v1112_v33 = vld [vmem:[#allocation5] sm:$0xff]  ;;  %v2378_v60 = vld [vmem:[%s3350_s9 + $0x8] sm:$0xff]  ;;  %s2809_s22 = smov 4   ;;  %s3398_s5 = sld [smem:[#allocation19_spill]] }
  0x85   : > { %630 = vrot.lane.b32.xlu0 %v3083_v2, %s2804_s18  ;;  %2443 = vmatpush3.msra.mxu1 %v3083_v2  ;;  %v1429_v28 = vld [vmem:[%s3349_s8] sm:$0xff]  ;;  %v2375_v47 = vld [vmem:[%s3348_s7 + $0x10] sm:$0xff]  ;;  %s590_s19 = scalar_lea.vmem [#allocation8], %s2352_s14  ;;  %s3400_s11 = sld [smem:[#allocation21_spill]] }
  0x86   : > { %2447 = vmatprep.subr.mxu1 %v2801_v0  ;;  %869 = vperm.xlu1 %2636, %v866_v4   ;;  %v613_v7 = vadd.s32 4294967295, %v3100_v6  ;;  %v617_v9 = vadd.s32 1, %v3100_v6  ;;  %v877_v29 = vld [vmem:[%s3344_s3] sm:$0xff]  ;;  %v609_v42 = vadd.s32 4294967294, %v3100_v6  ;;  %v621_v44 = vadd.s32 2, %v3100_v6  ;;  %v2382_v63 = vld [vmem:[%s3350_s9 + $0x10] sm:$0xff] }
  0x87   : > { %v2356_v3 = vld [vmem:[%s3391_s0 + $0x8] sm:$0xff]  ;;  %v635_v10 = vld [vmem:[%s3391_s0] sm:$0xff]  ;;  %v2360_v12 = vld [vmem:[%s3391_s0 + $0x10] sm:$0xff]  ;;  %s2242_s29 = scalar_lea.sflag [#allocation4], %s3063_s15 }
  0x88   : > { %2445 = vmatmul.mubr.msk.f32.vlgmr.msra.gmra.mrb[0].mxu1 %vm638_vm1, %v2356_v3  ;;  %vm614_vm2 = vcmp.ge.s32.totalorder %v613_v7, 0  ;;  %vm615_vm3 = vcmp.lt.s32.totalorder %v613_v7, 16  ;;  %vm619_vm5 = vcmp.lt.s32.totalorder %v617_v9, 16  ;;  %vm610_vm6 = vcmp.ge.s32.totalorder %v609_v42, 0  ;;  %v1199_v45 = vld [vmem:[%s3348_s7] sm:$0xff] }
  0x89   : > { %2449 = vmatprep.mubr.msk.f32.mxu1 %vm2802_vm0, %v2801_v0  ;;  %785 = vrot.lane.b32.xlu0 %v3083_v2, %s2805_s21  ;;  %vm3103_vm4 = vmand %vm614_vm2, %vm615_vm3  ;;  %vm611_vm7 = vcmp.lt.s32.totalorder %v609_v42, 16  ;;  %vm623_vm9 = vcmp.lt.s32.totalorder %v621_v44, 16  ;;  %v1668_v61 = vld [vmem:[%s3351_s10] sm:$0xff] }
  0x8a   : > { %vm3180_vm8 = vmand %vm610_vm6, %vm611_vm7  ;;  %v1440_v62 = vld [vmem:[%s3350_s9] sm:$0xff] }
  0xf7   : > { %v631_v11 = vpop.permute.xlu0 %630 }
  0xf8   : > { %2448 = vmatpush3.msk.msra.mxu1 %vm3103_vm4, %v631_v11 }
  0xf9   : > { %2450 = vmatmul.mubr.msk.f32.vlgmr.msra.gmra.mrb[2].mxu1 %vm638_vm1, %v635_v10  ;;  %2452 = vmatprep.subr.mxu1 %v2801_v0 }
  0xfa   : > { %2454 = vmatprep.mubr.msk.f32.mxu1 %vm2802_vm0, %v2801_v0 }
  0xfb   : > { %v786_v13 = vpop.permute.xlu0 %785 }
  0xfc   : > { %2453 = vmatpush3.msk.msra.mxu1 %vm619_vm5, %v786_v13 }
  0xfd   : > { %2455 = vmatmul.mubr.msk.f32.vlgmr.msra.gmra.mrb[4].mxu1 %vm638_vm1, %v2360_v12  ;;  %2457 = vmatprep.subr.mxu1 %v2801_v0 }
  0xfe   : > { %2459 = vmatprep.mubr.msk.f32.mxu1 %vm2802_vm0, %v2801_v0 }
 0x105   : > { %v870_v20 = vpop.permute.xlu1 %869 }
 0x15b   : > { %v708_v14 = vpop.f32.mrb[0].mxu1 }
 0x15c   : > { %v2446_v15 = vpop.f32.mrb[1].mxu1 }
 0x1cc   : > { %v781_v16 = vpop.f32.mrb[2].mxu1 }
 0x1cd   : > { %v782_v17 = vadd.f32 %v781_v16, %v708_v14  ;;  %v2451_v18 = vpop.f32.mrb[3].mxu1  ;;  %v1684_v16 = vld [vmem:[#allocation7 + $0x8] sm:$0xff] }
 0x1ce   : > { %v605_v18 = vadd.s32 4294967292, %v3100_v6 }
 0x1d0   : > { %v861_v19 = vpop.f32.mrb[4].mxu1  ;;  %vm606_vm10 = vcmp.ge.s32.totalorder %v605_v18, 0  ;;  %vm607_vm11 = vcmp.lt.s32.totalorder %v605_v18, 16 }
 0x1d1   : > { %v865_v21 = vadd.f32 %v861_v19, %v782_v17  ;;  %v2456_v22 = vpop.f32.mrb[5].mxu1  ;;  %v1912_v17 = vld [vmem:[%s3353_s12] sm:$0xff]  ;;  %v625_v19 = vadd.s32 4, %v3100_v6  ;;  %vm3243_vm12 = vmand %vm606_vm10, %vm607_vm11 }
 0x1d2   : > { %v1837_v22 = vld [vmem:[#allocation7 + $0x10] sm:$0xff] }
 0x1d3   : > { %v872_v23 = vadd.f32 %v870_v20, %v865_v21  ;;  %vm627_vm13 = vcmp.lt.s32.totalorder %v625_v19, 16  ;;  %v1682_v21 = vld [vmem:[#allocation7] sm:$0xff] }
 0x1d5   : > { %v873_v24 = vmax.f32 %v872_v23, 0.0 }
 0x1d7   : > { %1026 = vrot.lane.b32.xlu0 %v873_v24, %s2805_s21  ;;  %874 = vrot.lane.b32.xlu1 %v873_v24, %s2804_s18  ;;  %s3399_s18 = sld [smem:[#allocation20_spill]] }
 0x1d8   : > { %2458 = vmatpush3.msra.mxu1 %v873_v24 }
 0x1d9   : > { %2460 = vmatmul.mubr.msk.f32.vlgmr.msra.gmra.mrb[6].mxu1 %vm638_vm1, %v2363_v25  ;;  %2462 = vmatprep.subr.mxu1 %v2801_v0 }
 0x1da   : > { %2464 = vmatprep.mubr.msk.f32.mxu1 %vm2802_vm0, %v2801_v0 }
 0x1db   : > { %1116 = vperm.xlu0 %2637, %v1113_v26   ;;  %1108 = vperm.xlu1 %2636, %v1105_v27  }
 0x1dd   : > { %v2158_v42 = vld [vmem:[%s3399_s18] sm:$0xff] }
 0x1df   : > { %1432 = vperm.xlu0 %2637, %v1429_v28  }
 0x249   : > { %v875_v30 = vpop.permute.xlu1 %874  ;;  %v1027_v31 = vpop.permute.xlu0 %1026 }
 0x24a   : > { %2463 = vmatpush3.msk.msra.mxu1 %vm3103_vm4, %v875_v30 }
 0x24b   : > { %2465 = vmatmul.mubr.msk.f32.vlgmr.msra.gmra.mrb[6].mxu1 %vm638_vm1, %v877_v29  ;;  %2467 = vmatprep.subr.mxu1 %v2801_v0 }
 0x24c   : > { %2468 = vmatpush3.msk.msra.mxu1 %vm619_vm5, %v1027_v31  ;;  %2469 = vmatprep.mubr.msk.f32.mxu1 %vm2802_vm0, %v2801_v0 }
 0x24d   : > { %2472 = vmatprep.subr.mxu1 %v2801_v0 }
 0x253   : > { %2470 = vmatmul.mubr.msk.f32.vlgmr.msra.gmra.mrb[6].mxu1 %vm638_vm1, %v2367_v32 }
 0x254   : > { %2473 = vmatpush3.msra.mxu1 %v3083_v2  ;;  %2474 = vmatprep.mubr.msk.f32.mxu1 %vm2802_vm0, %v2801_v0 }
 0x255   : > { %2497 = vmatprep.subr.mxu1 %v2801_v0 }
 0x25a   : > { %v1117_v34 = vpop.permute.xlu0 %1116  ;;  %v1109_v35 = vpop.permute.xlu1 %1108 }
 0x25b   : > { %2475 = vmatmul.mubr.msk.f32.vlgmr.msra.gmra.mrb[6].mxu1 %vm638_vm1, %v1112_v33  ;;  %v2542_v36 = vadd.f32 %v1117_v34, %v1109_v35  ;;  %v2390_v35 = vld [vmem:[%s3354_s13 + $0x8] sm:$0xff] }
 0x25c   : > { %2499 = vmatprep.mubr.msk.f32.mxu1 %vm2802_vm0, %v2801_v0 }
 0x25e   : > { %v1433_v57 = vpop.permute.xlu0 %1432 }
 0x32e   : > { %v1188_v37 = vpop.f32.mrb[6].mxu1 }
 0x32f   : > { %v2543_v38 = vadd.f32 %v2542_v36, %v1188_v37  ;;  %v2476_v39 = vpop.f32.mrb[7].mxu1  ;;  %v2159_v36 = vld [vmem:[%s3357_s16] sm:$0xff] }
 0x330   : > { %v2151_v37 = vld [vmem:[%s3398_s5] sm:$0xff]  ;;  %s2255_s5 = sshll.u32 %s590_s19, 4  ;;  %s3299_s5 = int_to_ptr.vmem [resolvable:$true] %s2255_s5 }
 0x331   : > { %v3165_v40 = vmax.f32 %v2543_v38, 0.0  ;;  %v1923_v38 = vld [vmem:[%s3354_s13] sm:$0xff]  ;;  %s2724_s21 = scalar_lea.vmem %s3299_s5, 128 }
 0x332   : > { %p2725_p2 = scmp.ne.s32.totalorder %s3299_s5, %s2724_s21 }
 0x333   : > { %1194 = vrot.lane.b32.xlu1 %v3165_v40, %s2806_s1  ;;  %2478 = vmatpush3.msra.mxu0 %v3165_v40 }
 0x334   : > { %2480 = vmatmul.mubr.msk.f32.vlgmr.msra.gmra.mrb[0].mxu0 %vm638_vm1, %v2371_v41  ;;  %2482 = vmatprep.subr.mxu0 %v2801_v0  ;;  %v2394_v41 = vld [vmem:[%s3354_s13 + $0x10] sm:$0xff]  ;;  %p2726_p1 = pnand %p2725_p2, %p3014_p4 }
 0x335   : > { %2484 = vmatprep.mubr.msk.f32.mxu0 %vm2802_vm0, %v2801_v0 }
 0x336   : > { %p2727_p6 = pneg %p2726_p1 }
 0x337   : > { %1348 = vrot.lane.b32.xlu1 %v3165_v40, %s2807_s24 }
 0x3a5   : > { %v1195_v46 = vpop.permute.xlu1 %1194 }
 0x3a6   : > { %2483 = vmatpush3.msk.msra.mxu0 %vm3180_vm8, %v1195_v46 }
 0x3a7   : > { %2485 = vmatmul.mubr.msk.f32.vlgmr.msra.gmra.mrb[2].mxu0 %vm638_vm1, %v1199_v45  ;;  %2487 = vmatprep.subr.mxu0 %v2801_v0 }
 0x3a8   : > { %2489 = vmatprep.mubr.msk.f32.mxu0 %vm2802_vm0, %v2801_v0 }
 0x3a9   : > { %v1349_v48 = vpop.permute.xlu1 %1348 }
 0x3aa   : > { %2488 = vmatpush3.msk.msra.mxu0 %vm623_vm9, %v1349_v48 }
 0x3ab   : > { %2490 = vmatmul.mubr.msk.f32.vlgmr.msra.gmra.mrb[4].mxu0 %vm638_vm1, %v2375_v47  ;;  %2492 = vmatprep.subr.mxu0 %v2801_v0 }
 0x3ac   : > { %2494 = vmatprep.mubr.msk.f32.mxu0 %vm2802_vm0, %v2801_v0 }
 0x407   : > { %v1271_v49 = vpop.f32.mrb[0].mxu0 }
 0x408   : > { %v2481_v50 = vpop.f32.mrb[1].mxu0 }
 0x47a   : > { %v1344_v51 = vpop.f32.mrb[2].mxu0 }
 0x47b   : > { %v1345_v52 = vadd.f32 %v1344_v51, %v1271_v49  ;;  %v2486_v53 = vpop.f32.mrb[3].mxu0 }
 0x47e   : > { %v1424_v54 = vpop.f32.mrb[4].mxu0 }
 0x47f   : > { %v1428_v55 = vadd.f32 %v1424_v54, %v1345_v52  ;;  %v2491_v56 = vpop.f32.mrb[5].mxu0 }
 0x481   : > { %v1435_v58 = vadd.f32 %v1433_v57, %v1428_v55 }
 0x483   : > { %v1436_v59 = vmax.f32 %v1435_v58, 0.0 }
 0x485   : > { %1589 = vrot.lane.b32.xlu0 %v1436_v59, %s2807_s24  ;;  %1437 = vrot.lane.b32.xlu1 %v1436_v59, %s2806_s1  ;;  %s2808_s1 = smov 124   ;;  %s2399_s24 = sshll.u32 %s2922_s28, 7 }
 0x486   : > { %2493 = vmatpush3.msra.mxu0 %v1436_v59  ;;  %s3297_s17 = scalar_lea.hbm %s3400_s11, %s2399_s24  ;;  %s2810_s28 = smov [#allocation8]  }
 0x487   : > { %2495 = vmatmul.mubr.msk.f32.vlgmr.msra.gmra.mrb[6].mxu0 %vm638_vm1, %v2378_v60  ;;  %2502 = vmatprep.subr.mxu0 %v2801_v0  ;;  %s2728_s14 = sshll.u32 %s2810_s28, 4  ;;  %s2729_s14 = int_to_ptr.vmem [resolvable:$false] %s2728_s14 }
 0x488   : > { %2504 = vmatprep.mubr.msk.f32.mxu0 %vm2802_vm0, %v2801_v0  ;;  %s2730_s18 = scalar_lea.vmem %s2729_s14, 256  ;;  %p2731_p8 = scmp.lt.s32.totalorder %s3299_s5, %s2729_s14 }
 0x489   : > { %1671 = vperm.xlu1 %2636, %v1668_v61   ;;  %p2732_p12 = scmp.lt.s32.totalorder %s2730_s18, %s2724_s21 }
 0x48b   : > { %p2733_p3 = por %p2732_p12, %p2731_p8 }
 0x48d   : > { %p2734_p7 = pnand %p2733_p3, %p2727_p6 }
 0x4f7   : > { %v1590_v1 = vpop.permute.xlu0 %1589  ;;  %v1438_v2 = vpop.permute.xlu1 %1437 }
 0x4f8   : > { %2498 = vmatpush3.msk.msra.mxu1 %vm3180_vm8, %v1438_v2  ;;  %2503 = vmatpush3.msk.msra.mxu0 %vm623_vm9, %v1590_v1 }
 0x4f9   : > { %2500 = vmatmul.mubr.msk.f32.vlgmr.msra.gmra.mrb[8].mxu1 %vm638_vm1, %v1440_v62  ;;  %2505 = vmatmul.mubr.msk.f32.vlgmr.msra.gmra.mrb[8].mxu0 %vm638_vm1, %v2382_v63 }
 0x4fa   : > { %2507 = vmatprep.subr.mxu1 %v2801_v0  ;;  %2509 = vmatprep.mubr.msk.f32.mxu1 %vm2802_vm0, %v2801_v0 }
 0x4fb   : > { %2512 = vmatprep.subr.mxu0 %v2801_v0  ;;  %2514 = vmatprep.mubr.msk.f32.mxu0 %vm2802_vm0, %v2801_v0 }
 0x508   : > { %v1672_v12 = vpop.permute.xlu1 %1671 }
 0x55a   : > { %v1512_v3 = vpop.f32.mrb[6].mxu0 }
 0x55b   : > { %v2496_v4 = vpop.f32.mrb[7].mxu0 }
 0x5cc   : > { %v1585_v5 = vpop.f32.mrb[8].mxu1  ;;  %v1663_v7 = vpop.f32.mrb[8].mxu0 }
 0x5cd   : > { %v1586_v8 = vadd.f32 %v1585_v5, %v1512_v3  ;;  %v2501_v9 = vpop.f32.mrb[9].mxu1  ;;  %v2506_v10 = vpop.f32.mrb[9].mxu0 }
 0x5cf   : > { %v1667_v11 = vadd.f32 %v1663_v7, %v1586_v8 }
 0x5d1   : > { %v1674_v13 = vadd.f32 %v1672_v12, %v1667_v11 }
 0x5d3   : > { %v1675_v14 = vadd.f32 %v1674_v13, %v3165_v40 }
 0x5d5   : > { %v1676_v15 = vmax.f32 %v1675_v14, 0.0 }
 0x5d7   : > { %1831 = vrot.lane.b32.xlu1 %v1676_v15, %s2808_s1  ;;  %1677 = vrot.lane.b32.xlu0 %v1676_v15, %s2809_s22 }
 0x5d8   : > { %2508 = vmatpush3.msra.mxu1 %v1676_v15 }
 0x5d9   : > { %2510 = vmatmul.mubr.msk.f32.vlgmr.msra.gmra.mrb[10].mxu1 %vm638_vm1, %v1684_v16  ;;  %2517 = vmatprep.subr.mxu1 %v2801_v0 }
 0x5da   : > { %2519 = vmatprep.mubr.msk.f32.mxu1 %vm2802_vm0, %v2801_v0 }
 0x5db   : > { %1915 = vperm.xlu0 %2637, %v1912_v17  }
 0x649   : > { %v1832_v23 = vpop.permute.xlu1 %1831  ;;  %v1678_v24 = vpop.permute.xlu0 %1677 }
 0x64a   : > { %2513 = vmatpush3.msk.msra.mxu0 %vm3243_vm12, %v1678_v24  ;;  %2518 = vmatpush3.msk.msra.mxu1 %vm627_vm13, %v1832_v23 }
 0x64b   : > { %2515 = vmatmul.mubr.msk.f32.vlgmr.msra.gmra.mrb[10].mxu0 %vm638_vm1, %v1682_v21  ;;  %2520 = vmatmul.mubr.msk.f32.vlgmr.msra.gmra.mrb[12].mxu1 %vm638_vm1, %v1837_v22 }
 0x64c   : > { %2522 = vmatprep.subr.mxu0 %v2801_v0  ;;  %2524 = vmatprep.mubr.msk.f32.mxu0 %vm2802_vm0, %v2801_v0 }
 0x65a   : > { %v1916_v32 = vpop.permute.xlu0 %1915 }
 0x6ac   : > { %v1754_v6 = vpop.f32.mrb[10].mxu1 }
 0x6ad   : > { %v2511_v25 = vpop.f32.mrb[11].mxu1 }
 0x71e   : > { %v1827_v26 = vpop.f32.mrb[10].mxu0  ;;  %v1907_v27 = vpop.f32.mrb[12].mxu1 }
 0x71f   : > { %v1828_v28 = vadd.f32 %v1827_v26, %v1754_v6  ;;  %v2516_v29 = vpop.f32.mrb[11].mxu0  ;;  %v2521_v30 = vpop.f32.mrb[13].mxu1 }
 0x721   : > { %v1911_v31 = vadd.f32 %v1907_v27, %v1828_v28 }
 0x723   : > { %v1918_v33 = vadd.f32 %v1916_v32, %v1911_v31 }
 0x725   : > { %v1919_v34 = vmax.f32 %v1918_v33, 0.0 }
 0x727   : > { %2072 = vrot.lane.b32.xlu0 %v1919_v34, %s2808_s1  ;;  %1920 = vrot.lane.b32.xlu1 %v1919_v34, %s2809_s22 }
 0x728   : > { %2523 = vmatpush3.msra.mxu0 %v1919_v34 }
 0x729   : > { %2525 = vmatmul.mubr.msk.f32.vlgmr.msra.gmra.mrb[12].mxu0 %vm638_vm1, %v2390_v35  ;;  %2527 = vmatprep.subr.mxu0 %v2801_v0 }
 0x72a   : > { %2529 = vmatprep.mubr.msk.f32.mxu0 %vm2802_vm0, %v2801_v0 }
 0x72b   : > { %2162 = vperm.xlu0 %2637, %v2159_v36   ;;  %2154 = vperm.xlu1 %2636, %v2151_v37  }
 0x799   : > { %v1921_v39 = vpop.permute.xlu1 %1920  ;;  %v2073_v40 = vpop.permute.xlu0 %2072 }
 0x79a   : > { %2528 = vmatpush3.msk.msra.mxu0 %vm3243_vm12, %v1921_v39 }
 0x79b   : > { %2530 = vmatmul.mubr.msk.f32.vlgmr.msra.gmra.mrb[12].mxu0 %vm638_vm1, %v1923_v38  ;;  %2532 = vmatprep.subr.mxu0 %v2801_v0 }
 0x79c   : > { %2533 = vmatpush3.msk.msra.mxu0 %vm627_vm13, %v2073_v40  ;;  %2534 = vmatprep.mubr.msk.f32.mxu0 %vm2802_vm0, %v2801_v0 }
 0x79d   : > { %2537 = vmatprep.subr.mxu0 %v2801_v0 }
 0x7a3   : > { %2535 = vmatmul.mubr.msk.f32.vlgmr.msra.gmra.mrb[12].mxu0 %vm638_vm1, %v2394_v41 }
 0x7a4   : > { %2538 = vmatpush3.msra.mxu0 %v1676_v15  ;;  %2539 = vmatprep.mubr.msk.f32.mxu0 %vm2802_vm0, %v2801_v0 }
 0x7aa   : > { %v2163_v43 = vpop.permute.xlu0 %2162  ;;  %v2155_v44 = vpop.permute.xlu1 %2154 }
 0x7ab   : > { %2540 = vmatmul.mubr.msk.f32.vlgmr.msra.gmra.mrb[12].mxu0 %vm638_vm1, %v2158_v42  ;;  %v2544_v45 = vadd.f32 %v2163_v43, %v2155_v44 }
 0x87e   : > { %v2234_v46 = vpop.f32.mrb[12].mxu0 }
 0x87f   : > { %v2545_v47 = vadd.f32 %v2544_v45, %v2234_v46  ;;  %v2541_v48 = vpop.f32.mrb[13].mxu0 }
 0x881   : > { %v2239_v49 = vmax.f32 %v2545_v47, 0.0 }
 0x883   : > { %2240 = vst [vmem:[%s590_s19] sm:$0xff] %v2239_v49 }
 0x884   : > { %2737 = shalt.err (!%p2734_p7)
}
 0x885   : > { %s2738_s15 = scalar_lea.hbm %s3297_s17, 128  ;;  %s2742_s1 = scalar_lea.hbm %s3400_s11, 256 }
 0x886   : > { %p2739_p10 = scmp.ne.s32.totalorder %s3297_s17, %s2738_s15  ;;  %p2743_p0 = scmp.lt.u32.totalorder %s3297_s17, %s3400_s11 }
 0x887   : > { %p2744_p11 = scmp.lt.u32.totalorder %s2742_s1, %s2738_s15  ;;  %p2746_p2 = scmp.lt.u32.totalorder %s2738_s15, %s3297_s17 }
 0x888   : > { %p2740_p13 = pnand %p2739_p10, %p3014_p4 }
 0x889   : > { %p2745_p9 = por %p2744_p11, %p2743_p0 }
 0x88a   : > { %p2741_p5 = pneg %p2740_p13 }
 0x88b   : > { %p2747_p1 = por %p2746_p2, %p2745_p9 }
 0x88d   : > { %p2748_p6 = pnand %p2747_p1, %p2741_p5 }
 0x88f   : > { %2751 = shalt.err (!%p2748_p6)
}
 0x890   : > { %2568 = dma.vmem_to_hbm [thread:$0]  (%p3014_p4), %s3299_s5, 128, %s3297_s17, %s2242_s29  }
 0x891 PF: > { %s3401_s21 = sld [smem:[#allocation12_spill]]  ;;  %s3402_s14 = sld [smem:[#allocation13_spill]] }
 0x892   : > { %p3404_p12 = scmp.ge.s32.totalorder %s2794_s27, 2 }
 0x897   : > { %s2267_s18 = sand.u32 1, %s3401_s21   ;;  %p3403_p8 = scmp.ne.s32.totalorder %s3402_s14, 0 }
 0x898   : > { %s2268_s24 = scalar_lea.sflag [#allocation4], %s2267_s18 }
 0x899   : > { %p2582_p3 = pnand %p3404_p12, %p3403_p8 }
 0x89b   : > { %2777 = dma.done.wait (!%p2582_p3), %s2268_s24, 128  }
 0x89c   : > { %2779 = vsyncadd (!%p2582_p3), %s2268_s24, 4294967168  ;;  %s3405_s15 = sld [smem:[#allocation14_spill]]  ;;  %p31_p7 = scmp.ge.s32.totalorder %s3004_s30, 4  }
 0x89d   : > { %s3406_s24 = smov %s2786_s25  ;;  %s3407_s25 = smov %s2790_s26 }
 0x89e   : > { %s3409_s27 = smov %s3004_s30  ;;  %33 = sbr.rel (!%p31_p7) target bundleno = 14 (0xe), region = 153 }
 0x8a2   : > { %s3408_s26 = smov %s3405_s15 }
 0x8a5   :  { %2273 = vsyncpa [#allocation3], 1 }
 0x8a6   :  { %2275 = vsyncpa [#allocation3 + $0x1], 1 }
 0x8a7   :  { %2276 = vsyncpa [#allocation6], 1 }
 0x8a8   :  { %2277 = vsyncpa [#allocation4], 1 }
 0x8a9   :  { %2279 = vsyncpa [#allocation4 + $0x1], 1 }

// kernel: tpu_custom_call.1
= control target key start
LH: loop header
LB: loop body
LE: loop exit
PB: predicated region body
PF: predicated region fallthrough
CT: control target
= control target key end

     0   :  { %s3341_s0 = inlined_call_operand.hbm [shape: f32[8,256], index: 0, kind: input, shape index: {}]   ;;  %s3342_s1 = inlined_call_operand.vmem [shape: f32[3,8,8], index: 1, kind: input, shape index: {}]   ;;  %s3343_s2 = inlined_call_operand.vmem [shape: f32[8,1], index: 2, kind: input, shape index: {}]   ;;  %s3344_s3 = inlined_call_operand.vmem [shape: f32[3,8,8], index: 3, kind: input, shape index: {}]   ;;  %s3345_s4 = inlined_call_operand.vmem [shape: f32[8,1], index: 4, kind: input, shape index: {}]   ;;  %s3346_s5 = inlined_call_operand.hbm [shape: f32[8,8], index: 5, kind: input, shape index: {}]   ;;  %s3347_s6 = inlined_call_operand.vmem [shape: f32[8,1], index: 6, kind: input, shape index: {}]   ;;  %s3348_s7 = inlined_call_operand.vmem [shape: f32[3,8,8], index: 7, kind: input, shape index: {}]   ;;  %s3349_s8 = inlined_call_operand.vmem [shape: f32[8,1], index: 8, kind: input, shape index: {}]   ;;  %s3350_s9 = inlined_call_operand.vmem [shape: f32[3,8,8], index: 9, kind: input, shape index: {}]   ;;  %s3351_s10 = inlined_call_operand.vmem [shape: f32[8,1], index: 10, kind: input, shape index: {}]   ;;  %s3352_s11 = inlined_call_operand.hbm [shape: f32[3,8,8], index: 11, kind: input, shape index: {}]   ;;  %s3353_s12 = inlined_call_operand.vmem [shape: f32[8,1], index: 12, kind: input, shape index: {}]   ;;  %s3354_s13 = inlined_call_operand.vmem [shape: f32[3,8,8], index: 13, kind: input, shape index: {}]   ;;  %s3355_s14 = inlined_call_operand.vmem [shape: f32[8,1], index: 14, kind: input, shape index: {}]   ;;  %s3356_s15 = inlined_call_operand.vmem [shape: f32[8,8], index: 15, kind: input, shape index: {}]   ;;  %s3357_s16 = inlined_call_operand.vmem [shape: f32[8,1], index: 16, kind: input, shape index: {}]   ;;  %s3358_s17 = inlined_call_operand.hbm [shape: f32[8,256], index: 17, kind: output, shape index: {}]  }
   0x1   :  { %3367 = sst [smem:[#allocation15_spill]] %s3341_s0 }
   0x2   :  { %3368 = sst [smem:[#allocation16_spill]] %s3342_s1 }
   0x3   :  { %3369 = sst [smem:[#allocation17_spill]] %s3346_s5 }
   0x4   :  { %3370 = sst [smem:[#allocation18_spill]] %s3352_s11 }
   0x5   :  { %3371 = sst [smem:[#allocation19_spill]] %s3355_s14 }
   0x6   :  { %3372 = sst [smem:[#allocation20_spill]] %s3356_s15 }
   0x7   :  { %3373 = sst [smem:[#allocation21_spill]] %s3358_s17 }
   0x8   :  { %22 = vsyncpa [#allocation3], 0 }
   0x9   :  { %24 = vsyncpa [#allocation3 + $0x1], 0 }
   0xa   :  { %25 = vsyncpa [#allocation6], 0 }
   0xb   :  { %26 = vsyncpa [#allocation4], 0 }
   0xc   :  { %28 = vsyncpa [#allocation4 + $0x1], 0  ;;  %s2901_s24 = smov 0   ;;  %s2903_s25 = smov 0  }
   0xd   :  { %s2905_s26 = smov 0   ;;  %s2907_s27 = smov 0  }
   0xe LB: > { %3374 = sst [smem:[#allocation12_spill]] %s2782_s24  ;;  %s2922_s28 = sadd.s32 4294967295, %s2794_s27   ;;  %s2794_s27 = sphi %s2907_s27, %s3409_s27   ;;  %s2790_s26 = sphi %s2905_s26, %s3408_s26   ;;  %s2786_s25 = sphi %s2903_s25, %s3407_s25   ;;  %s2782_s24 = sphi %s2901_s24, %s3406_s24  }
   0xf   : > { %s2344_s29 = sadd.s32 4294967294, %s2794_s27   ;;  %p54_p0 = scmp.ne.s32.totalorder %s2786_s25, %s2782_s24 }
  0x10   : > { %p3364_p1 = scmp.eq.s32.totalorder %s2922_s28, 0  ;;  %p420_p3 = scmp.eq.s32.totalorder %s2344_s29, 1 }
  0x11   : > { %p2345_p5 = scmp.ge.s32.totalorder %s2794_s27, 1  ;;  %p427_p7 = scmp.lt.s32.totalorder %s2794_s27, 3 }
  0x12   : > { %p2931_p4 = por %p3364_p1, %p54_p0  ;;  %p2936_p6 = por %p420_p3, %p54_p0 }
  0x13   : > { %p2941_p8 = pnand %p2345_p5, %p427_p7  ;;  %s2796_s19 = smov [#allocation5]  }
  0x14   : > { %s3375_s0 = scalar_select %p2931_p4, 1, 0 }
  0x15   : > { %s3376_s30 = scalar_select %p2936_p6, 1, 0 }
  0x16   : > { %s3378_s18 = scalar_select %p2941_p8, 1, 0 }
  0x17   : > { %3377 = sst [smem:[#allocation13_spill]] %s3376_s30  ;;  %s452_s1 = sshll.u32 %s2796_s19, 4  ;;  %s453_s1 = int_to_ptr.vmem [resolvable:$true] %s452_s1 }
  0x18   : > { %p2570_p10 = pneg %p2941_p8  ;;  %s2797_s20 = smov [#allocation7]  }
  0x19   : > { %s477_s21 = sshll.u32 %s2797_s20, 4  ;;  %s3380_s5 = sld [smem:[#allocation17_spill]]  ;;  %s2954_s21 = int_to_ptr.vmem [resolvable:$true] %s477_s21 }
  0x1a   : > { %p2950_p11 = pnand %p2570_p10, %p3364_p1 }
  0x1c   : > { %p2640_p13 = pneg %p2950_p11 }
  0x1f   : > { %s2638_s30 = scalar_lea.hbm %s3380_s5, 128 }
  0x20   : > { %p2639_p12 = scmp.ne.s32.totalorder %s3380_s5, %s2638_s30  ;;  %p2645_p5 = scmp.lt.u32.totalorder %s2638_s30, %s3380_s5 }
  0x22   : > { %p2641_p0 = pnand %p2640_p13, %p2639_p12 }
  0x24   : > { %p2642_p3 = pneg %p2641_p0 }
  0x26   : > { %p2647_p7 = pnand %p2645_p5, %p2642_p3 }
  0x28   : > { %2650 = shalt.err (!%p2647_p7)
}
  0x29   : > { %s2651_s15 = scalar_lea.vmem %s453_s1, 128  ;;  %p2659_p2 = scmp.lt.s32.totalorder %s453_s1, %s453_s1 }
  0x2a   : > { %p2652_p10 = scmp.ne.s32.totalorder %s453_s1, %s2651_s15  ;;  %p2660_p6 = scmp.lt.s32.totalorder %s2651_s15, %s2651_s15 }
  0x2c   : > { %p2654_p9 = pnand %p2652_p10, %p2640_p13  ;;  %p2661_p4 = por %p2660_p6, %p2659_p2 }
  0x2e   : > { %p2655_p1 = pneg %p2654_p9 }
  0x30   : > { %p2662_p8 = pnand %p2661_p4, %p2655_p1 }
  0x32   : > { %2665 = shalt.err (!%p2662_p8)
}
  0x33   : > { %2573 = dma.hbm_to_vmem [thread:$0]  (!%p2950_p11), %s3380_s5, 128, %s453_s1, [#allocation6]  }
  0x34   : > { %s3381_s11 = sld [smem:[#allocation18_spill]] }
  0x3a   : > { %s2666_s29 = scalar_lea.hbm %s3381_s11, 384 }
  0x3b   : > { %p2667_p9 = scmp.ne.s32.totalorder %s3381_s11, %s2666_s29  ;;  %p2673_p4 = scmp.lt.u32.totalorder %s2666_s29, %s3381_s11 }
  0x3d   : > { %p2669_p2 = pnand %p2667_p9, %p2640_p13 }
  0x3f   : > { %p2670_p1 = pneg %p2669_p2 }
  0x41   : > { %p2675_p6 = pnand %p2673_p4, %p2670_p1 }
  0x43   : > { %2678 = shalt.err (!%p2675_p6)
}
  0x44   : > { %s2679_s1 = scalar_lea.vmem %s2954_s21, 384  ;;  %p2687_p3 = scmp.lt.s32.totalorder %s2954_s21, %s2954_s21 }
  0x45   : > { %p2680_p8 = scmp.ne.s32.totalorder %s2954_s21, %s2679_s1  ;;  %p2688_p5 = scmp.lt.s32.totalorder %s2679_s1, %s2679_s1 }
  0x47   : > { %p2682_p12 = pnand %p2680_p8, %p2640_p13  ;;  %p2689_p7 = por %p2688_p5, %p2687_p3 }
  0x49   : > { %p2683_p0 = pneg %p2682_p12 }
  0x4b   : > { %p2690_p10 = pnand %p2689_p7, %p2683_p0 }
  0x4d   : > { %2693 = shalt.err (!%p2690_p10)
}
  0x4e   : > { %s2798_s14 = smov 128   ;;  %s2799_s24 = smov 8  }
  0x4f   : > { %2576 = dma.hbm_to_vmem [thread:$0]  (!%p2950_p11), %s3381_s11, 384, %s2954_s21, [#allocation6], %s2798_s14, %s2798_s14, %s2799_s24  }
  0x50   : > { %s3004_s30 = sadd.s32 1, %s2794_s27   ;;  %s41_s29 = sadd.s32 1, %s2790_s26 }
  0x51   : > { %s38_s19 = ssub.s32 %s2794_s27, %s3004_s30  ;;  %p48_p13 = scmp.ne.s32.totalorder %s2790_s26, %s2786_s25 }
  0x52   : > { %p39_p9 = scmp.eq.s32.totalorder %s38_s19, 0  ;;  %p49_p2 = scmp.eq.s32.totalorder %s2794_s27, 0 }
  0x53   : > { %p3382_p1 = scmp.eq.s32.totalorder %s2922_s28, 1  ;;  %p2587_p6 = scmp.lt.s32.totalorder %s2794_s27, 2 }
  0x54   : > { %s3020_s15 = scalar_select %p39_p9, %s2790_s26, %s41_s29  }
  0x55   : > { %p3014_p4 = por %p3382_p1, %p48_p13  ;;  %p50_p8 = por %p49_p2, %p48_p13 }
  0x56   : > { %3384 = sst [smem:[#allocation14_spill]] %s3020_s15  ;;  %s506_s22 = sand.u32 1, %s2790_s26  }
  0x57   : > { %s2349_s1 = sshll.u32 %s506_s22, 3  ;;  %s2350_s21 = sshll.u32 %s2794_s27, 7 }
  0x58   : > { %s3385_s23 = sld [smem:[#allocation15_spill]]  ;;  %s510_s19 = scalar_lea.vmem [#allocation2], %s2349_s1 }
  0x59   : > { %s517_s5 = sshll.u32 %s510_s19, 4  ;;  %p3031_p11 = pnand %p2587_p6, %p50_p8  ;;  %s3029_s5 = int_to_ptr.vmem [resolvable:$true] %s517_s5 }
  0x5a   : > { %s507_s11 = scalar_lea.sflag [#allocation3], %s506_s22 }
  0x5b   : > { %p2696_p0 = pneg %p3031_p11 }
  0x5e   : > { %s3027_s17 = scalar_lea.hbm %s3385_s23, %s2350_s21  ;;  %s2699_s14 = scalar_lea.hbm %s3385_s23, 256 }
  0x5f   : > { %s2694_s15 = scalar_lea.hbm %s3027_s17, 128  ;;  %p2700_p7 = scmp.lt.u32.totalorder %s3027_s17, %s3385_s23 }
  0x60   : > { %p2695_p12 = scmp.ne.s32.totalorder %s3027_s17, %s2694_s15  ;;  %p2701_p10 = scmp.lt.u32.totalorder %s2699_s14, %s2694_s15 }
  0x61   : > { %p2703_p9 = scmp.lt.u32.totalorder %s2694_s15, %s3027_s17 }
  0x62   : > { %p2697_p3 = pnand %p2696_p0, %p2695_p12  ;;  %p2702_p13 = por %p2701_p10, %p2700_p7 }
  0x64   : > { %p2698_p5 = pneg %p2697_p3  ;;  %p2704_p2 = por %p2703_p9, %p2702_p13 }
  0x66   : > { %p2705_p1 = pnand %p2704_p2, %p2698_p5 }
  0x68   : > { %2708 = shalt.err (!%p2705_p1)
}
  0x69   : > { %s2709_s22 = scalar_lea.vmem %s3029_s5, 128  ;;  %s2800_s21 = smov [#allocation2]  }
  0x6a   : > { %p2710_p6 = scmp.ne.s32.totalorder %s3029_s5, %s2709_s22  ;;  %s2714_s1 = sshll.u32 %s2800_s21, 4  ;;  %s2715_s1 = int_to_ptr.vmem [resolvable:$false] %s2714_s1 }
  0x6b   : > { %s2716_s24 = scalar_lea.vmem %s2715_s1, 256  ;;  %p2717_p3 = scmp.lt.s32.totalorder %s3029_s5, %s2715_s1 }
  0x6c   : > { %p2712_p8 = pnand %p2710_p6, %p2696_p0  ;;  %p2718_p7 = scmp.lt.s32.totalorder %s2716_s24, %s2709_s22 }
  0x6e   : > { %p2713_p12 = pneg %p2712_p8  ;;  %p2719_p10 = por %p2718_p7, %p2717_p3 }
  0x70   : > { %p2720_p13 = pnand %p2719_p10, %p2713_p12 }
  0x72   : > { %2723 = shalt.err (!%p2720_p13)
}
  0x73   : > { %2580 = dma.hbm_to_vmem [thread:$0]  (!%p3031_p11), %s3027_s17, 128, %s3029_s5, %s507_s11  }
  0x74   : > { %p3387_p5 = scmp.ne.s32.totalorder %s3378_s18, 0 }
  0x75   : > { %s3063_s15 = sand.u32 (!%p3387_p5), 1, %s2786_s25   ;;  %p3388_p0 = scmp.ne.s32.totalorder (!%p3387_p5), %s3375_s0, 0 }
  0x76   : > { %526 = sbr.rel (%p3387_p5) target bundleno = 2193 (0x891), region = 88  ;;  %s2352_s14 = sshll.u32 (!%p3387_p5), %s3063_s15, 3 }
  0x77   : > { %s529_s19 = scalar_lea.sflag (!%p3387_p5), [#allocation3], %s3063_s15  ;;  %s532_s22 = scalar_lea.vmem (!%p3387_p5), [#allocation2], %s2352_s14 }
  0x7d   : > { %2769 = dma.done.wait (%p3388_p0), %s529_s19, 128  }
  0x7e   : > { %2771 = vsyncadd (%p3388_p0), %s529_s19, 4294967168  ;;  %p3389_p11 = scmp.eq.s32.totalorder %s2922_s28, 0 }
  0x80   : > { %2773 = dma.done.wait (%p3389_p11), [#allocation6], 512   ;;  %p3390_p9 = pmov %p3389_p11 }
  0x81   : > { %v2801_v0 = vmov 0.0   ;;  %vm2802_vm0 = vmmov 0   ;;  %v2803_v1 = vmov 0   ;;  %vm638_vm1 = vcmask 64512   ;;  %v3083_v2 = vld [vmem:[%s532_s22] sm:$0xff]  ;;  %s3391_s0 = sld [smem:[#allocation16_spill]] }
  0x82   : > { %2775 = vsyncadd (%p3390_p9), [#allocation6], 4294966784  ;;  %2442 = vmatprep.subr.mxu1 %v2801_v0  ;;  %2444 = vmatprep.mubr.msk.f32.mxu1 %vm2802_vm0, %v2801_v0  ;;  %s2804_s18 = smov 1   ;;  %v866_v4 = vld [vmem:[%s3343_s2] sm:$0xff]  ;;  %s2805_s21 = smov 127   ;;  %v591_v5 = vlaneseq  ;;  %v2363_v25 = vld [vmem:[%s3344_s3 + $0x8] sm:$0xff] }
  0x83   : > { %2636 = vset.pattern.permute.xlu1 %v2803_v1  ;;  %2637 = vset.pattern.permute.xlu0 %v2803_v1  ;;  %v1113_v26 = vld [vmem:[%s3347_s6] sm:$0xff]  ;;  %v2367_v32 = vld [vmem:[%s3344_s3 + $0x10] sm:$0xff]  ;;  %v2371_v41 = vld [vmem:[%s3348_s7 + $0x8] sm:$0xff]  ;;  %s2806_s1 = smov 2   ;;  %s2807_s24 = smov 126  }
  0x84   : > { %2477 = vmatprep.subr.mxu0 %v2801_v0  ;;  %2479 = vmatprep.mubr.msk.f32.mxu0 %vm2802_vm0, %v2801_v0  ;;  %v3100_v6 = vand.u32 127, %v591_v5  ;;  %v1105_v27 = vld [vmem:[%s3345_s4] sm:$0xff]  ;;  %v1112_v33 = vld [vmem:[#allocation5] sm:$0xff]  ;;  %v2378_v60 = vld [vmem:[%s3350_s9 + $0x8] sm:$0xff]  ;;  %s2809_s22 = smov 4   ;;  %s3398_s5 = sld [smem:[#allocation19_spill]] }
  0x85   : > { %630 = vrot.lane.b32.xlu0 %v3083_v2, %s2804_s18  ;;  %2443 = vmatpush3.msra.mxu1 %v3083_v2  ;;  %v1429_v28 = vld [vmem:[%s3349_s8] sm:$0xff]  ;;  %v2375_v47 = vld [vmem:[%s3348_s7 + $0x10] sm:$0xff]  ;;  %s590_s19 = scalar_lea.vmem [#allocation8], %s2352_s14  ;;  %s3400_s11 = sld [smem:[#allocation21_spill]] }
  0x86   : > { %2447 = vmatprep.subr.mxu1 %v2801_v0  ;;  %869 = vperm.xlu1 %2636, %v866_v4   ;;  %v613_v7 = vadd.s32 4294967295, %v3100_v6  ;;  %v617_v9 = vadd.s32 1, %v3100_v6  ;;  %v877_v29 = vld [vmem:[%s3344_s3] sm:$0xff]  ;;  %v609_v42 = vadd.s32 4294967294, %v3100_v6  ;;  %v621_v44 = vadd.s32 2, %v3100_v6  ;;  %v2382_v63 = vld [vmem:[%s3350_s9 + $0x10] sm:$0xff] }
  0x87   : > { %v2356_v3 = vld [vmem:[%s3391_s0 + $0x8] sm:$0xff]  ;;  %v635_v10 = vld [vmem:[%s3391_s0] sm:$0xff]  ;;  %v2360_v12 = vld [vmem:[%s3391_s0 + $0x10] sm:$0xff]  ;;  %s2242_s29 = scalar_lea.sflag [#allocation4], %s3063_s15 }
  0x88   : > { %2445 = vmatmul.mubr.msk.f32.vlgmr.msra.gmra.mrb[0].mxu1 %vm638_vm1, %v2356_v3  ;;  %vm614_vm2 = vcmp.ge.s32.totalorder %v613_v7, 0  ;;  %vm615_vm3 = vcmp.lt.s32.totalorder %v613_v7, 16  ;;  %vm619_vm5 = vcmp.lt.s32.totalorder %v617_v9, 16  ;;  %vm610_vm6 = vcmp.ge.s32.totalorder %v609_v42, 0  ;;  %v1199_v45 = vld [vmem:[%s3348_s7] sm:$0xff] }
  0x89   : > { %2449 = vmatprep.mubr.msk.f32.mxu1 %vm2802_vm0, %v2801_v0  ;;  %785 = vrot.lane.b32.xlu0 %v3083_v2, %s2805_s21  ;;  %vm3103_vm4 = vmand %vm614_vm2, %vm615_vm3  ;;  %vm611_vm7 = vcmp.lt.s32.totalorder %v609_v42, 16  ;;  %vm623_vm9 = vcmp.lt.s32.totalorder %v621_v44, 16  ;;  %v1668_v61 = vld [vmem:[%s3351_s10] sm:$0xff] }
  0x8a   : > { %vm3180_vm8 = vmand %vm610_vm6, %vm611_vm7  ;;  %v1440_v62 = vld [vmem:[%s3350_s9] sm:$0xff] }
  0xf7   : > { %v631_v11 = vpop.permute.xlu0 %630 }
  0xf8   : > { %2448 = vmatpush3.msk.msra.mxu1 %vm3103_vm4, %v631_v11 }
  0xf9   : > { %2450 = vmatmul.mubr.msk.f32.vlgmr.msra.gmra.mrb[2].mxu1 %vm638_vm1, %v635_v10  ;;  %2452 = vmatprep.subr.mxu1 %v2801_v0 }
  0xfa   : > { %2454 = vmatprep.mubr.msk.f32.mxu1 %vm2802_vm0, %v2801_v0 }
  0xfb   : > { %v786_v13 = vpop.permute.xlu0 %785 }
  0xfc   : > { %2453 = vmatpush3.msk.msra.mxu1 %vm619_vm5, %v786_v13 }
  0xfd   : > { %2455 = vmatmul.mubr.msk.f32.vlgmr.msra.gmra.mrb[4].mxu1 %vm638_vm1, %v2360_v12  ;;  %2457 = vmatprep.subr.mxu1 %v2801_v0 }
  0xfe   : > { %2459 = vmatprep.mubr.msk.f32.mxu1 %vm2802_vm0, %v2801_v0 }
 0x105   : > { %v870_v20 = vpop.permute.xlu1 %869 }
 0x15b   : > { %v708_v14 = vpop.f32.mrb[0].mxu1 }
 0x15c   : > { %v2446_v15 = vpop.f32.mrb[1].mxu1 }
 0x1cc   : > { %v781_v16 = vpop.f32.mrb[2].mxu1 }
 0x1cd   : > { %v782_v17 = vadd.f32 %v781_v16, %v708_v14  ;;  %v2451_v18 = vpop.f32.mrb[3].mxu1  ;;  %v1684_v16 = vld [vmem:[#allocation7 + $0x8] sm:$0xff] }
 0x1ce   : > { %v605_v18 = vadd.s32 4294967292, %v3100_v6 }
 0x1d0   : > { %v861_v19 = vpop.f32.mrb[4].mxu1  ;;  %vm606_vm10 = vcmp.ge.s32.totalorder %v605_v18, 0  ;;  %vm607_vm11 = vcmp.lt.s32.totalorder %v605_v18, 16 }
 0x1d1   : > { %v865_v21 = vadd.f32 %v861_v19, %v782_v17  ;;  %v2456_v22 = vpop.f32.mrb[5].mxu1  ;;  %v1912_v17 = vld [vmem:[%s3353_s12] sm:$0xff]  ;;  %v625_v19 = vadd.s32 4, %v3100_v6  ;;  %vm3243_vm12 = vmand %vm606_vm10, %vm607_vm11 }
 0x1d2   : > { %v1837_v22 = vld [vmem:[#allocation7 + $0x10] sm:$0xff] }
 0x1d3   : > { %v872_v23 = vadd.f32 %v870_v20, %v865_v21  ;;  %vm627_vm13 = vcmp.lt.s32.totalorder %v625_v19, 16  ;;  %v1682_v21 = vld [vmem:[#allocation7] sm:$0xff] }
 0x1d5   : > { %v873_v24 = vmax.f32 %v872_v23, 0.0 }
 0x1d7   : > { %1026 = vrot.lane.b32.xlu0 %v873_v24, %s2805_s21  ;;  %874 = vrot.lane.b32.xlu1 %v873_v24, %s2804_s18  ;;  %s3399_s18 = sld [smem:[#allocation20_spill]] }
 0x1d8   : > { %2458 = vmatpush3.msra.mxu1 %v873_v24 }
 0x1d9   : > { %2460 = vmatmul.mubr.msk.f32.vlgmr.msra.gmra.mrb[6].mxu1 %vm638_vm1, %v2363_v25  ;;  %2462 = vmatprep.subr.mxu1 %v2801_v0 }
 0x1da   : > { %2464 = vmatprep.mubr.msk.f32.mxu1 %vm2802_vm0, %v2801_v0 }
 0x1db   : > { %1116 = vperm.xlu0 %2637, %v1113_v26   ;;  %1108 = vperm.xlu1 %2636, %v1105_v27  }
 0x1dd   : > { %v2158_v42 = vld [vmem:[%s3399_s18] sm:$0xff] }
 0x1df   : > { %1432 = vperm.xlu0 %2637, %v1429_v28  }
 0x249   : > { %v875_v30 = vpop.permute.xlu1 %874  ;;  %v1027_v31 = vpop.permute.xlu0 %1026 }
 0x24a   : > { %2463 = vmatpush3.msk.msra.mxu1 %vm3103_vm4, %v875_v30 }
 0x24b   : > { %2465 = vmatmul.mubr.msk.f32.vlgmr.msra.gmra.mrb[6].mxu1 %vm638_vm1, %v877_v29  ;;  %2467 = vmatprep.subr.mxu1 %v2801_v0 }
 0x24c   : > { %2468 = vmatpush3.msk.msra.mxu1 %vm619_vm5, %v1027_v31  ;;  %2469 = vmatprep.mubr.msk.f32.mxu1 %vm2802_vm0, %v2801_v0 }
 0x24d   : > { %2472 = vmatprep.subr.mxu1 %v2801_v0 }
 0x253   : > { %2470 = vmatmul.mubr.msk.f32.vlgmr.msra.gmra.mrb[6].mxu1 %vm638_vm1, %v2367_v32 }
 0x254   : > { %2473 = vmatpush3.msra.mxu1 %v3083_v2  ;;  %2474 = vmatprep.mubr.msk.f32.mxu1 %vm2802_vm0, %v2801_v0 }
 0x255   : > { %2497 = vmatprep.subr.mxu1 %v2801_v0 }
 0x25a   : > { %v1117_v34 = vpop.permute.xlu0 %1116  ;;  %v1109_v35 = vpop.permute.xlu1 %1108 }
 0x25b   : > { %2475 = vmatmul.mubr.msk.f32.vlgmr.msra.gmra.mrb[6].mxu1 %vm638_vm1, %v1112_v33  ;;  %v2542_v36 = vadd.f32 %v1117_v34, %v1109_v35  ;;  %v2390_v35 = vld [vmem:[%s3354_s13 + $0x8] sm:$0xff] }
 0x25c   : > { %2499 = vmatprep.mubr.msk.f32.mxu1 %vm2802_vm0, %v2801_v0 }
 0x25e   : > { %v1433_v57 = vpop.permute.xlu0 %1432 }
 0x32e   : > { %v1188_v37 = vpop.f32.mrb[6].mxu1 }
 0x32f   : > { %v2543_v38 = vadd.f32 %v2542_v36, %v1188_v37  ;;  %v2476_v39 = vpop.f32.mrb[7].mxu1  ;;  %v2159_v36 = vld [vmem:[%s3357_s16] sm:$0xff] }
 0x330   : > { %v2151_v37 = vld [vmem:[%s3398_s5] sm:$0xff]  ;;  %s2255_s5 = sshll.u32 %s590_s19, 4  ;;  %s3299_s5 = int_to_ptr.vmem [resolvable:$true] %s2255_s5 }
 0x331   : > { %v3165_v40 = vmax.f32 %v2543_v38, 0.0  ;;  %v1923_v38 = vld [vmem:[%s3354_s13] sm:$0xff]  ;;  %s2724_s21 = scalar_lea.vmem %s3299_s5, 128 }
 0x332   : > { %p2725_p2 = scmp.ne.s32.totalorder %s3299_s5, %s2724_s21 }
 0x333   : > { %1194 = vrot.lane.b32.xlu1 %v3165_v40, %s2806_s1  ;;  %2478 = vmatpush3.msra.mxu0 %v3165_v40 }
 0x334   : > { %2480 = vmatmul.mubr.msk.f32.vlgmr.msra.gmra.mrb[0].mxu0 %vm638_vm1, %v2371_v41  ;;  %2482 = vmatprep.subr.mxu0 %v2801_v0  ;;  %v2394_v41 = vld [vmem:[%s3354_s13 + $0x10] sm:$0xff]  ;;  %p2726_p1 = pnand %p2725_p2, %p3014_p4 }
 0x335   : > { %2484 = vmatprep.mubr.msk.f32.mxu0 %vm2802_vm0, %v2801_v0 }
 0x336   : > { %p2727_p6 = pneg %p2726_p1 }
 0x337   : > { %1348 = vrot.lane.b32.xlu1 %v3165_v40, %s2807_s24 }
 0x3a5   : > { %v1195_v46 = vpop.permute.xlu1 %1194 }
 0x3a6   : > { %2483 = vmatpush3.msk.msra.mxu0 %vm3180_vm8, %v1195_v46 }
 0x3a7   : > { %2485 = vmatmul.mubr.msk.f32.vlgmr.msra.gmra.mrb[2].mxu0 %vm638_vm1, %v1199_v45  ;;  %2487 = vmatprep.subr.mxu0 %v2801_v0 }
 0x3a8   : > { %2489 = vmatprep.mubr.msk.f32.mxu0 %vm2802_vm0, %v2801_v0 }
 0x3a9   : > { %v1349_v48 = vpop.permute.xlu1 %1348 }
 0x3aa   : > { %2488 = vmatpush3.msk.msra.mxu0 %vm623_vm9, %v1349_v48 }
 0x3ab   : > { %2490 = vmatmul.mubr.msk.f32.vlgmr.msra.gmra.mrb[4].mxu0 %vm638_vm1, %v2375_v47  ;;  %2492 = vmatprep.subr.mxu0 %v2801_v0 }
 0x3ac   : > { %2494 = vmatprep.mubr.msk.f32.mxu0 %vm2802_vm0, %v2801_v0 }
 0x407   : > { %v1271_v49 = vpop.f32.mrb[0].mxu0 }
 0x408   : > { %v2481_v50 = vpop.f32.mrb[1].mxu0 }
 0x47a   : > { %v1344_v51 = vpop.f32.mrb[2].mxu0 }
 0x47b   : > { %v1345_v52 = vadd.f32 %v1344_v51, %v1271_v49  ;;  %v2486_v53 = vpop.f32.mrb[3].mxu0 }
 0x47e   : > { %v1424_v54 = vpop.f32.mrb[4].mxu0 }
 0x47f   : > { %v1428_v55 = vadd.f32 %v1424_v54, %v1345_v52  ;;  %v2491_v56 = vpop.f32.mrb[5].mxu0 }
 0x481   : > { %v1435_v58 = vadd.f32 %v1433_v57, %v1428_v55 }
 0x483   : > { %v1436_v59 = vmax.f32 %v1435_v58, 0.0 }
 0x485   : > { %1589 = vrot.lane.b32.xlu0 %v1436_v59, %s2807_s24  ;;  %1437 = vrot.lane.b32.xlu1 %v1436_v59, %s2806_s1  ;;  %s2808_s1 = smov 124   ;;  %s2399_s24 = sshll.u32 %s2922_s28, 7 }
 0x486   : > { %2493 = vmatpush3.msra.mxu0 %v1436_v59  ;;  %s3297_s17 = scalar_lea.hbm %s3400_s11, %s2399_s24  ;;  %s2810_s28 = smov [#allocation8]  }
 0x487   : > { %2495 = vmatmul.mubr.msk.f32.vlgmr.msra.gmra.mrb[6].mxu0 %vm638_vm1, %v2378_v60  ;;  %2502 = vmatprep.subr.mxu0 %v2801_v0  ;;  %s2728_s14 = sshll.u32 %s2810_s28, 4  ;;  %s2729_s14 = int_to_ptr.vmem [resolvable:$false] %s2728_s14 }
 0x488   : > { %2504 = vmatprep.mubr.msk.f32.mxu0 %vm2802_vm0, %v2801_v0  ;;  %s2730_s18 = scalar_lea.vmem %s2729_s14, 256  ;;  %p2731_p8 = scmp.lt.s32.totalorder %s3299_s5, %s2729_s14 }
 0x489   : > { %1671 = vperm.xlu1 %2636, %v1668_v61   ;;  %p2732_p12 = scmp.lt.s32.totalorder %s2730_s18, %s2724_s21 }
 0x48b   : > { %p2733_p3 = por %p2732_p12, %p2731_p8 }
 0x48d   : > { %p2734_p7 = pnand %p2733_p3, %p2727_p6 }
 0x4f7   : > { %v1590_v1 = vpop.permute.xlu0 %1589  ;;  %v1438_v2 = vpop.permute.xlu1 %1437 }
 0x4f8   : > { %2498 = vmatpush3.msk.msra.mxu1 %vm3180_vm8, %v1438_v2  ;;  %2503 = vmatpush3.msk.msra.mxu0 %vm623_vm9, %v1590_v1 }
 0x4f9   : > { %2500 = vmatmul.mubr.msk.f32.vlgmr.msra.gmra.mrb[8].mxu1 %vm638_vm1, %v1440_v62  ;;  %2505 = vmatmul.mubr.msk.f32.vlgmr.msra.gmra.mrb[8].mxu0 %vm638_vm1, %v2382_v63 }
 0x4fa   : > { %2507 = vmatprep.subr.mxu1 %v2801_v0  ;;  %2509 = vmatprep.mubr.msk.f32.mxu1 %vm2802_vm0, %v2801_v0 }
 0x4fb   : > { %2512 = vmatprep.subr.mxu0 %v2801_v0  ;;  %2514 = vmatprep.mubr.msk.f32.mxu0 %vm2802_vm0, %v2801_v0 }
 0x508   : > { %v1672_v12 = vpop.permute.xlu1 %1671 }
 0x55a   : > { %v1512_v3 = vpop.f32.mrb[6].mxu0 }
 0x55b   : > { %v2496_v4 = vpop.f32.mrb[7].mxu0 }
 0x5cc   : > { %v1585_v5 = vpop.f32.mrb[8].mxu1  ;;  %v1663_v7 = vpop.f32.mrb[8].mxu0 }
 0x5cd   : > { %v1586_v8 = vadd.f32 %v1585_v5, %v1512_v3  ;;  %v2501_v9 = vpop.f32.mrb[9].mxu1  ;;  %v2506_v10 = vpop.f32.mrb[9].mxu0 }
 0x5cf   : > { %v1667_v11 = vadd.f32 %v1663_v7, %v1586_v8 }
 0x5d1   : > { %v1674_v13 = vadd.f32 %v1672_v12, %v1667_v11 }
 0x5d3   : > { %v1675_v14 = vadd.f32 %v1674_v13, %v3165_v40 }
 0x5d5   : > { %v1676_v15 = vmax.f32 %v1675_v14, 0.0 }
 0x5d7   : > { %1831 = vrot.lane.b32.xlu1 %v1676_v15, %s2808_s1  ;;  %1677 = vrot.lane.b32.xlu0 %v1676_v15, %s2809_s22 }
 0x5d8   : > { %2508 = vmatpush3.msra.mxu1 %v1676_v15 }
 0x5d9   : > { %2510 = vmatmul.mubr.msk.f32.vlgmr.msra.gmra.mrb[10].mxu1 %vm638_vm1, %v1684_v16  ;;  %2517 = vmatprep.subr.mxu1 %v2801_v0 }
 0x5da   : > { %2519 = vmatprep.mubr.msk.f32.mxu1 %vm2802_vm0, %v2801_v0 }
 0x5db   : > { %1915 = vperm.xlu0 %2637, %v1912_v17  }
 0x649   : > { %v1832_v23 = vpop.permute.xlu1 %1831  ;;  %v1678_v24 = vpop.permute.xlu0 %1677 }
 0x64a   : > { %2513 = vmatpush3.msk.msra.mxu0 %vm3243_vm12, %v1678_v24  ;;  %2518 = vmatpush3.msk.msra.mxu1 %vm627_vm13, %v1832_v23 }
 0x64b   : > { %2515 = vmatmul.mubr.msk.f32.vlgmr.msra.gmra.mrb[10].mxu0 %vm638_vm1, %v1682_v21  ;;  %2520 = vmatmul.mubr.msk.f32.vlgmr.msra.gmra.mrb[12].mxu1 %vm638_vm1, %v1837_v22 }
 0x64c   : > { %2522 = vmatprep.subr.mxu0 %v2801_v0  ;;  %2524 = vmatprep.mubr.msk.f32.mxu0 %vm2802_vm0, %v2801_v0 }
 0x65a   : > { %v1916_v32 = vpop.permute.xlu0 %1915 }
 0x6ac   : > { %v1754_v6 = vpop.f32.mrb[10].mxu1 }
 0x6ad   : > { %v2511_v25 = vpop.f32.mrb[11].mxu1 }
 0x71e   : > { %v1827_v26 = vpop.f32.mrb[10].mxu0  ;;  %v1907_v27 = vpop.f32.mrb[12].mxu1 }
 0x71f   : > { %v1828_v28 = vadd.f32 %v1827_v26, %v1754_v6  ;;  %v2516_v29 = vpop.f32.mrb[11].mxu0  ;;  %v2521_v30 = vpop.f32.mrb[13].mxu1 }
 0x721   : > { %v1911_v31 = vadd.f32 %v1907_v27, %v1828_v28 }
 0x723   : > { %v1918_v33 = vadd.f32 %v1916_v32, %v1911_v31 }
 0x725   : > { %v1919_v34 = vmax.f32 %v1918_v33, 0.0 }
 0x727   : > { %2072 = vrot.lane.b32.xlu0 %v1919_v34, %s2808_s1  ;;  %1920 = vrot.lane.b32.xlu1 %v1919_v34, %s2809_s22 }
 0x728   : > { %2523 = vmatpush3.msra.mxu0 %v1919_v34 }
 0x729   : > { %2525 = vmatmul.mubr.msk.f32.vlgmr.msra.gmra.mrb[12].mxu0 %vm638_vm1, %v2390_v35  ;;  %2527 = vmatprep.subr.mxu0 %v2801_v0 }
 0x72a   : > { %2529 = vmatprep.mubr.msk.f32.mxu0 %vm2802_vm0, %v2801_v0 }
 0x72b   : > { %2162 = vperm.xlu0 %2637, %v2159_v36   ;;  %2154 = vperm.xlu1 %2636, %v2151_v37  }
 0x799   : > { %v1921_v39 = vpop.permute.xlu1 %1920  ;;  %v2073_v40 = vpop.permute.xlu0 %2072 }
 0x79a   : > { %2528 = vmatpush3.msk.msra.mxu0 %vm3243_vm12, %v1921_v39 }
 0x79b   : > { %2530 = vmatmul.mubr.msk.f32.vlgmr.msra.gmra.mrb[12].mxu0 %vm638_vm1, %v1923_v38  ;;  %2532 = vmatprep.subr.mxu0 %v2801_v0 }
 0x79c   : > { %2533 = vmatpush3.msk.msra.mxu0 %vm627_vm13, %v2073_v40  ;;  %2534 = vmatprep.mubr.msk.f32.mxu0 %vm2802_vm0, %v2801_v0 }
 0x79d   : > { %2537 = vmatprep.subr.mxu0 %v2801_v0 }
 0x7a3   : > { %2535 = vmatmul.mubr.msk.f32.vlgmr.msra.gmra.mrb[12].mxu0 %vm638_vm1, %v2394_v41 }
 0x7a4   : > { %2538 = vmatpush3.msra.mxu0 %v1676_v15  ;;  %2539 = vmatprep.mubr.msk.f32.mxu0 %vm2802_vm0, %v2801_v0 }
 0x7aa   : > { %v2163_v43 = vpop.permute.xlu0 %2162  ;;  %v2155_v44 = vpop.permute.xlu1 %2154 }
 0x7ab   : > { %2540 = vmatmul.mubr.msk.f32.vlgmr.msra.gmra.mrb[12].mxu0 %vm638_vm1, %v2158_v42  ;;  %v2544_v45 = vadd.f32 %v2163_v43, %v2155_v44 }
 0x87e   : > { %v2234_v46 = vpop.f32.mrb[12].mxu0 }
 0x87f   : > { %v2545_v47 = vadd.f32 %v2544_v45, %v2234_v46  ;;  %v2541_v48 = vpop.f32.mrb[13].mxu0 }
 0x881   : > { %v2239_v49 = vmax.f32 %v2545_v47, 0.0 }
 0x883   : > { %2240 = vst [vmem:[%s590_s19] sm:$0xff] %v2239_v49 }
 0x884   : > { %2737 = shalt.err (!%p2734_p7)
}
 0x885   : > { %s2738_s15 = scalar_lea.hbm %s3297_s17, 128  ;;  %s2742_s1 = scalar_lea.hbm %s3400_s11, 256 }
 0x886   : > { %p2739_p10 = scmp.ne.s32.totalorder %s3297_s17, %s2738_s15  ;;  %p2743_p0 = scmp.lt.u32.totalorder %s3297_s17, %s3400_s11 }
 0x887   : > { %p2744_p11 = scmp.lt.u32.totalorder %s2742_s1, %s2738_s15  ;;  %p2746_p2 = scmp.lt.u32.totalorder %s2738_s15, %s3297_s17 }
 0x888   : > { %p2740_p13 = pnand %p2739_p10, %p3014_p4 }
 0x889   : > { %p2745_p9 = por %p2744_p11, %p2743_p0 }
 0x88a   : > { %p2741_p5 = pneg %p2740_p13 }
 0x88b   : > { %p2747_p1 = por %p2746_p2, %p2745_p9 }
 0x88d   : > { %p2748_p6 = pnand %p2747_p1, %p2741_p5 }
 0x88f   : > { %2751 = shalt.err (!%p2748_p6)
}
 0x890   : > { %2568 = dma.vmem_to_hbm [thread:$0]  (%p3014_p4), %s3299_s5, 128, %s3297_s17, %s2242_s29  }
 0x891 PF: > { %s3401_s21 = sld [smem:[#allocation12_spill]]  ;;  %s3402_s14 = sld [smem:[#allocation13_spill]] }
 0x892   : > { %p3404_p12 = scmp.ge.s32.totalorder %s2794_s27, 2 }
 0x897   : > { %s2267_s18 = sand.u32 1, %s3401_s21   ;;  %p3403_p8 = scmp.ne.s32.totalorder %s3402_s14, 0 }
 0x898   : > { %s2268_s24 = scalar_lea.sflag [#allocation4], %s2267_s18 }
 0x899   : > { %p2582_p3 = pnand %p3404_p12, %p3403_p8 }
 0x89b   : > { %2777 = dma.done.wait (!%p2582_p3), %s2268_s24, 128  }
 0x89c   : > { %2779 = vsyncadd (!%p2582_p3), %s2268_s24, 4294967168  ;;  %s3405_s15 = sld [smem:[#allocation14_spill]]  ;;  %p31_p7 = scmp.ge.s32.totalorder %s3004_s30, 4  }
 0x89d   : > { %s3406_s24 = smov %s2786_s25  ;;  %s3407_s25 = smov %s2790_s26 }
 0x89e   : > { %s3409_s27 = smov %s3004_s30  ;;  %33 = sbr.rel (!%p31_p7) target bundleno = 14 (0xe), region = 153 }
 0x8a2   : > { %s3408_s26 = smov %s3405_s15 }
 0x8a5   :  { %2273 = vsyncpa [#allocation3], 1 }
 0x8a6   :  { %2275 = vsyncpa [#allocation3 + $0x1], 1 }
 0x8a7   :  { %2276 = vsyncpa [#allocation6], 1 }
 0x8a8   :  { %2277 = vsyncpa [#allocation4], 1 }
 0x8a9   :  { %2279 = vsyncpa [#allocation4 + $0x1], 1 }

</bundles_post_ra>
